<compile_context>
chip_gen: v7x
topology: tpu7x:2x2x1
jax: 0.10.0
libtpu: 0.0.40
codegen_flags: <defaults>
</compile_context>

<pallas_src>
import functools

import jax
import jax.numpy as jnp
from jax.experimental import pallas as pl
from jax.experimental.pallas import tpu as pltpu

IN_DIM = 28 * 28      # 784
H1, H2 = 256, 128
H3_PAD = 128          # true 64, zero-padded to lane width
OUT_PAD = 128         # true 10, zero-padded to lane width
NUM_CLASSES = 10
MAX_TB = 1024         # default cap on the batch tile


def _mlp_kernel(x_ref,
                w1_ref, b1_ref,
                w2_ref, b2_ref,
                w3_ref, b3_ref,
                w4_ref, b4_ref,
                out_ref):
    """Whole 4-layer MLP fused in one kernel (all weights stay in VMEM).

    Matmuls run bf16 x bf16 -> f32 on the MXU; bias-add / ReLU stay f32 on
    the VPU (v5e has no bf16 VPU path). Output is stored as a lane-dense
    (tb, 128) bf16 slab.
    """
    x = x_ref[...]                                                    # (tb, 784) bf16

    h = jnp.dot(x, w1_ref[...], preferred_element_type=jnp.float32)  # (tb, 256)
    h = jnp.maximum(h + b1_ref[...], 0.0)
    # dropout(p=0.2) == identity in eval mode

    h = jnp.dot(h.astype(jnp.bfloat16), w2_ref[...],
                preferred_element_type=jnp.float32)                   # (tb, 128)
    h = jnp.maximum(h + b2_ref[...], 0.0)

    h = jnp.dot(h.astype(jnp.bfloat16), w3_ref[...],
                preferred_element_type=jnp.float32)                   # (tb, 128) [64 real]
    h = jnp.maximum(h + b3_ref[...], 0.0)                             # padded lanes stay 0

    h = jnp.dot(h.astype(jnp.bfloat16), w4_ref[...],
                preferred_element_type=jnp.float32)                   # (tb, 128) [10 real]
    out_ref[...] = (h + b4_ref[...]).astype(out_ref.dtype)


def _pack_params(params):
    """Cast weights to bf16 and zero-pad the narrow tail to lane width 128."""
    (w1, b1), (w2, b2), (w3, b3), (w4, b4) = params

    w1p = w1.astype(jnp.bfloat16)                                # (784, 256)
    w2p = w2.astype(jnp.bfloat16)                                # (256, 128)

    w3p = jnp.zeros((H2, H3_PAD), jnp.bfloat16).at[:, :w3.shape[1]].set(
        w3.astype(jnp.bfloat16))                                 # (128, 128)
    b3p = jnp.zeros((1, H3_PAD), jnp.float32).at[:, :b3.shape[1]].set(
        b3.astype(jnp.float32))

    w4p = jnp.zeros((H3_PAD, OUT_PAD), jnp.bfloat16)
    w4p = w4p.at[:w4.shape[0], :w4.shape[1]].set(w4.astype(jnp.bfloat16))
    b4p = jnp.zeros((1, OUT_PAD), jnp.float32).at[:, :b4.shape[1]].set(
        b4.astype(jnp.float32))

    return (w1p, b1.astype(jnp.float32),
            w2p, b2.astype(jnp.float32),
            w3p, b3p,
            w4p, b4p)


def _choose_batch_tile(B, *, max_tb=MAX_TB, num_cores=1):
    """One batch tile per TensorCore when possible (pass num_cores=2 on v7x).

    Returns a tile size tb. For B <= tile budget a single full-batch block is
    used (legal for any B, no HBM padding copy). Otherwise tb is a multiple
    of 8 and the ragged last grid step is masked by Pallas.
    """
    n_steps = max(num_cores, pl.cdiv(B, max_tb))
    if num_cores > 1 and n_steps % num_cores:
        n_steps += num_cores - (n_steps % num_cores)   # balanced split across TCs
    tb = -(-B // n_steps)          # ceil
    tb = -(-tb // 8) * 8           # round up to a sublane multiple
    if tb >= B:
        return B                   # single block == full array dim (always legal)
    return tb


def mlp_forward(x, params, *, max_tb=MAX_TB, num_cores=1):
    """x: (B, 1, 28, 28) or (B, 784), ideally bf16. Returns (B, 10) float32."""
    x2d = x.reshape(-1, IN_DIM)    # same semantics as x.view(-1, 784); no copy
    if x2d.dtype != jnp.bfloat16:
        # NOTE: prefer handing bf16 (or uint8) pixels to this function so the
        # cast fuses into the upstream producer instead of becoming a
        # standalone HBM convert pass.
        x2d = x2d.astype(jnp.bfloat16)
    B = x2d.shape[0]

    tb = _choose_batch_tile(B, max_tb=max_tb, num_cores=num_cores)
    n_steps = pl.cdiv(B, tb)       # ragged last step (if any) is masked by Pallas

    w1, b1, w2, b2, w3, b3, w4, b4 = _pack_params(params)

    # Constant index_maps keep the (small, ~0.6 MB) weights VMEM-resident.
    def full(shape):
        return pl.BlockSpec(shape, lambda i: tuple(0 for _ in shape))

    out = pl.pallas_call(
        _mlp_kernel,
        out_shape=jax.ShapeDtypeStruct((B, OUT_PAD), jnp.bfloat16),
        grid_spec=pltpu.PrefetchScalarGridSpec(
            num_scalar_prefetch=0,
            grid=(n_steps,),
            in_specs=[
                pl.BlockSpec((tb, IN_DIM), lambda i: (i, 0)),    # x batch tile (bf16)
                full(w1.shape), full(b1.shape),
                full(w2.shape), full(b2.shape),
                full(w3.shape), full(b3.shape),
                full(w4.shape), full(b4.shape),
            ],
            out_specs=pl.BlockSpec((tb, OUT_PAD), lambda i: (i, 0)),  # lane-dense slab
        ),
        compiler_params=pltpu.CompilerParams(
            dimension_semantics=("parallel",),          # shards steps across v7x TCs
            vmem_limit_bytes=32 * 1024 * 1024,          # safe on v7x (64 MiB physical)
        ),
    )(x2d, w1, b1, w2, b2, w3, b3, w4, b4)

    return out[:, :NUM_CLASSES].astype(jnp.float32)


def init_params(key):
    """Deterministic init mirroring nn.Linear shapes.

    Weights are stored transposed relative to PyTorch, i.e. (in, out),
    biases as (1, out) for clean 2-D broadcasting on TPU.
    """
    dims = [(IN_DIM, 256), (256, 128), (128, 64), (64, 10)]
    params = []
    for (fan_in, fan_out) in dims:
        key, kw, kb = jax.random.split(key, 3)
        bound = 1.0 / jnp.sqrt(fan_in)   # PyTorch default U(-1/sqrt(fan_in), +1/sqrt(fan_in))
        w = jax.random.uniform(kw, (fan_in, fan_out), jnp.float32, -bound, bound)
        b = jax.random.uniform(kb, (1, fan_out), jnp.float32, -bound, bound)
        params.append((w, b))
    return params


def reference_forward_f32(x, params):
    """Pure-JAX f32 reference (PyTorch semantics)."""
    h = x.reshape(-1, IN_DIM).astype(jnp.float32)
    (w1, b1), (w2, b2), (w3, b3), (w4, b4) = params
    h = jnp.maximum(h @ w1 + b1, 0.0)
    h = jnp.maximum(h @ w2 + b2, 0.0)
    h = jnp.maximum(h @ w3 + b3, 0.0)
    return h @ w4 + b4


def reference_forward_bf16(x, params):
    """Pure-JAX reference at the kernel's precision (bf16 matmul, f32 accum,
    bf16 output rounding)."""
    h = x.reshape(-1, IN_DIM).astype(jnp.bfloat16)
    for i, (w, b) in enumerate(params):
        h = jnp.dot(h.astype(jnp.bfloat16), w.astype(jnp.bfloat16),
                    preferred_element_type=jnp.float32) + b
        if i < 3:
            h = jnp.maximum(h, 0.0)
    return h.astype(jnp.bfloat16).astype(jnp.float32)


if __name__ == "__main__":
    key = jax.random.PRNGKey(0)
    kx, kp = jax.random.split(key)
    params = init_params(kp)

    # bf16 pixels (NCHW like PyTorch) -> no wrapper-side convert pass.
    B = 200
    x = jax.random.normal(kx, (B, 1, 28, 28), dtype=jnp.bfloat16)

    # Default path: single full-batch tile, one grid step.
    out = jax.block_until_ready(jax.jit(mlp_forward)(x, params))
    assert out.shape == (B, NUM_CLASSES)

    ref_bf16 = reference_forward_bf16(x, params)
    ref_f32 = reference_forward_f32(x, params)
    assert jnp.allclose(out, ref_bf16, atol=1.5e-2, rtol=1.5e-2), "mismatch vs bf16 reference"
    assert jnp.allclose(out, ref_f32, atol=8e-2, rtol=8e-2), "mismatch vs f32 reference"

    # Multi-step path with a ragged last tile (tb=56 -> 4 grid steps), no HBM pad copy.
    fwd_multi = jax.jit(functools.partial(mlp_forward, max_tb=64))
    out2 = jax.block_until_ready(fwd_multi(x, params))
    assert jnp.allclose(out2, ref_bf16, atol=1.5e-2, rtol=1.5e-2), "multi-step mismatch"

    # Tiny batch (non-multiple of 8) -> single full-dim block.
    x_small = jax.random.normal(kx, (6, 1, 28, 28), dtype=jnp.bfloat16)
    out3 = jax.block_until_ready(jax.jit(mlp_forward)(x_small, params))
    assert out3.shape == (6, NUM_CLASSES)

    print("KERNEL_OK")
</pallas_src>

<mosaic_0001>
module attributes {stable_mosaic.version = 11 : i64} {
  func.func @_mlp_kernel(%arg0: i32, %arg1: memref<200x784xbf16, #tpu.memory_space<vmem>>, %arg2: memref<784x256xbf16, #tpu.memory_space<vmem>>, %arg3: memref<1x256xf32, #tpu.memory_space<vmem>>, %arg4: memref<256x128xbf16, #tpu.memory_space<vmem>>, %arg5: memref<1x128xf32, #tpu.memory_space<vmem>>, %arg6: memref<128x128xbf16, #tpu.memory_space<vmem>>, %arg7: memref<1x128xf32, #tpu.memory_space<vmem>>, %arg8: memref<128x128xbf16, #tpu.memory_space<vmem>>, %arg9: memref<1x128xf32, #tpu.memory_space<vmem>>, %arg10: memref<200x128xbf16, #tpu.memory_space<vmem>>) attributes {dimension_semantics = [#tpu.dimension_semantics<parallel>], iteration_bounds = array<i64: 1>, scalar_prefetch = 0 : i64, scratch_operands = 0 : i64, tpu.core_type = #tpu.core_type<tc>, window_params = [{transform_indices = @transform_0, window_bounds = array<i64: 200, 784>}, {pipeline_mode = #tpu.pipeline_mode<synchronous>, transform_indices = @transform_1, window_bounds = array<i64: 784, 256>}, {pipeline_mode = #tpu.pipeline_mode<synchronous>, transform_indices = @transform_2, window_bounds = array<i64: 1, 256>}, {pipeline_mode = #tpu.pipeline_mode<synchronous>, transform_indices = @transform_3, window_bounds = array<i64: 256, 128>}, {pipeline_mode = #tpu.pipeline_mode<synchronous>, transform_indices = @transform_4, window_bounds = array<i64: 1, 128>}, {pipeline_mode = #tpu.pipeline_mode<synchronous>, transform_indices = @transform_5, window_bounds = array<i64: 128, 128>}, {pipeline_mode = #tpu.pipeline_mode<synchronous>, transform_indices = @transform_6, window_bounds = array<i64: 1, 128>}, {pipeline_mode = #tpu.pipeline_mode<synchronous>, transform_indices = @transform_7, window_bounds = array<i64: 128, 128>}, {pipeline_mode = #tpu.pipeline_mode<synchronous>, transform_indices = @transform_8, window_bounds = array<i64: 1, 128>}, {transform_indices = @transform_9, window_bounds = array<i64: 200, 128>}]} {
    %c0 = arith.constant 0 : index
    %c0_0 = arith.constant 0 : index
    %0 = vector.load %arg1[%c0, %c0_0] : memref<200x784xbf16, #tpu.memory_space<vmem>>, vector<200x784xbf16>
    %c0_1 = arith.constant 0 : index
    %c0_2 = arith.constant 0 : index
    %1 = vector.load %arg2[%c0_1, %c0_2] : memref<784x256xbf16, #tpu.memory_space<vmem>>, vector<784x256xbf16>
    %cst = arith.constant dense<0.000000e+00> : vector<200x256xf32>
    %2 = tpu.matmul %0, %1, %cst {dimension_numbers = #tpu.dot_dimension_numbers<[1], [0], [0], [1], [0, 0, 1, 1], [], []>} : vector<200x784xbf16>, vector<784x256xbf16>, vector<200x256xf32> -> vector<200x256xf32>
    %c0_3 = arith.constant 0 : index
    %c0_4 = arith.constant 0 : index
    %3 = vector.load %arg3[%c0_3, %c0_4] : memref<1x256xf32, #tpu.memory_space<vmem>>, vector<1x256xf32>
    %4 = vector.broadcast %3 : vector<1x256xf32> to vector<200x256xf32>
    %5 = arith.addf %2, %4 : vector<200x256xf32>
    %cst_5 = arith.constant 0.000000e+00 : f32
    %6 = vector.broadcast %cst_5 : f32 to vector<200x256xf32>
    %7 = arith.maximumf %5, %6 : vector<200x256xf32>
    %8 = arith.truncf %7 : vector<200x256xf32> to vector<200x256xbf16>
    %c0_6 = arith.constant 0 : index
    %c0_7 = arith.constant 0 : index
    %9 = vector.load %arg4[%c0_6, %c0_7] : memref<256x128xbf16, #tpu.memory_space<vmem>>, vector<256x128xbf16>
    %cst_8 = arith.constant dense<0.000000e+00> : vector<200x128xf32>
    %10 = tpu.matmul %8, %9, %cst_8 {dimension_numbers = #tpu.dot_dimension_numbers<[1], [0], [0], [1], [0, 0, 1, 1], [], []>} : vector<200x256xbf16>, vector<256x128xbf16>, vector<200x128xf32> -> vector<200x128xf32>
    %c0_9 = arith.constant 0 : index
    %c0_10 = arith.constant 0 : index
    %11 = vector.load %arg5[%c0_9, %c0_10] : memref<1x128xf32, #tpu.memory_space<vmem>>, vector<1x128xf32>
    %12 = vector.broadcast %11 : vector<1x128xf32> to vector<200x128xf32>
    %13 = arith.addf %10, %12 : vector<200x128xf32>
    %cst_11 = arith.constant 0.000000e+00 : f32
    %14 = vector.broadcast %cst_11 : f32 to vector<200x128xf32>
    %15 = arith.maximumf %13, %14 : vector<200x128xf32>
    %16 = arith.truncf %15 : vector<200x128xf32> to vector<200x128xbf16>
    %c0_12 = arith.constant 0 : index
    %c0_13 = arith.constant 0 : index
    %17 = vector.load %arg6[%c0_12, %c0_13] : memref<128x128xbf16, #tpu.memory_space<vmem>>, vector<128x128xbf16>
    %cst_14 = arith.constant dense<0.000000e+00> : vector<200x128xf32>
    %18 = tpu.matmul %16, %17, %cst_14 {dimension_numbers = #tpu.dot_dimension_numbers<[1], [0], [0], [1], [0, 0, 1, 1], [], []>} : vector<200x128xbf16>, vector<128x128xbf16>, vector<200x128xf32> -> vector<200x128xf32>
    %c0_15 = arith.constant 0 : index
    %c0_16 = arith.constant 0 : index
    %19 = vector.load %arg7[%c0_15, %c0_16] : memref<1x128xf32, #tpu.memory_space<vmem>>, vector<1x128xf32>
    %20 = vector.broadcast %19 : vector<1x128xf32> to vector<200x128xf32>
    %21 = arith.addf %18, %20 : vector<200x128xf32>
    %cst_17 = arith.constant 0.000000e+00 : f32
    %22 = vector.broadcast %cst_17 : f32 to vector<200x128xf32>
    %23 = arith.maximumf %21, %22 : vector<200x128xf32>
    %24 = arith.truncf %23 : vector<200x128xf32> to vector<200x128xbf16>
    %c0_18 = arith.constant 0 : index
    %c0_19 = arith.constant 0 : index
    %25 = vector.load %arg8[%c0_18, %c0_19] : memref<128x128xbf16, #tpu.memory_space<vmem>>, vector<128x128xbf16>
    %cst_20 = arith.constant dense<0.000000e+00> : vector<200x128xf32>
    %26 = tpu.matmul %24, %25, %cst_20 {dimension_numbers = #tpu.dot_dimension_numbers<[1], [0], [0], [1], [0, 0, 1, 1], [], []>} : vector<200x128xbf16>, vector<128x128xbf16>, vector<200x128xf32> -> vector<200x128xf32>
    %c0_21 = arith.constant 0 : index
    %c0_22 = arith.constant 0 : index
    %27 = vector.load %arg9[%c0_21, %c0_22] : memref<1x128xf32, #tpu.memory_space<vmem>>, vector<1x128xf32>
    %28 = vector.broadcast %27 : vector<1x128xf32> to vector<200x128xf32>
    %29 = arith.addf %26, %28 : vector<200x128xf32>
    %30 = arith.truncf %29 : vector<200x128xf32> to vector<200x128xbf16>
    %c0_23 = arith.constant 0 : index
    %c0_24 = arith.constant 0 : index
    %31 = vector.load %arg10[%c0_23, %c0_24] : memref<200x128xbf16, #tpu.memory_space<vmem>>, vector<200x128xbf16>
    tpu.vector_store %arg10[%c0_23, %c0_24], %30 {strides = array<i32>} : memref<200x128xbf16, #tpu.memory_space<vmem>>, vector<200x128xbf16>,
    return
  }
  func.func @transform_0(%arg0: i32) -> (i32, i32) {
    %c0_i32 = arith.constant 0 : i32
    %c0_i32_0 = arith.constant 0 : i32
    return %arg0, %c0_i32 : i32, i32
  }
  func.func @transform_1(%arg0: i32) -> (i32, i32) {
    %c0_i32 = arith.constant 0 : i32
    %c0_i32_0 = arith.constant 0 : i32
    %c0_i32_1 = arith.constant 0 : i32
    return %c0_i32, %c0_i32_0 : i32, i32
  }
  func.func @transform_2(%arg0: i32) -> (i32, i32) {
    %c0_i32 = arith.constant 0 : i32
    %c0_i32_0 = arith.constant 0 : i32
    %c0_i32_1 = arith.constant 0 : i32
    return %c0_i32, %c0_i32_0 : i32, i32
  }
  func.func @transform_3(%arg0: i32) -> (i32, i32) {
    %c0_i32 = arith.constant 0 : i32
    %c0_i32_0 = arith.constant 0 : i32
    %c0_i32_1 = arith.constant 0 : i32
    return %c0_i32, %c0_i32_0 : i32, i32
  }
  func.func @transform_4(%arg0: i32) -> (i32, i32) {
    %c0_i32 = arith.constant 0 : i32
    %c0_i32_0 = arith.constant 0 : i32
    %c0_i32_1 = arith.constant 0 : i32
    return %c0_i32, %c0_i32_0 : i32, i32
  }
  func.func @transform_5(%arg0: i32) -> (i32, i32) {
    %c0_i32 = arith.constant 0 : i32
    %c0_i32_0 = arith.constant 0 : i32
    %c0_i32_1 = arith.constant 0 : i32
    return %c0_i32, %c0_i32_0 : i32, i32
  }
  func.func @transform_6(%arg0: i32) -> (i32, i32) {
    %c0_i32 = arith.constant 0 : i32
    %c0_i32_0 = arith.constant 0 : i32
    %c0_i32_1 = arith.constant 0 : i32
    return %c0_i32, %c0_i32_0 : i32, i32
  }
  func.func @transform_7(%arg0: i32) -> (i32, i32) {
    %c0_i32 = arith.constant 0 : i32
    %c0_i32_0 = arith.constant 0 : i32
    %c0_i32_1 = arith.constant 0 : i32
    return %c0_i32, %c0_i32_0 : i32, i32
  }
  func.func @transform_8(%arg0: i32) -> (i32, i32) {
    %c0_i32 = arith.constant 0 : i32
    %c0_i32_0 = arith.constant 0 : i32
    %c0_i32_1 = arith.constant 0 : i32
    return %c0_i32, %c0_i32_0 : i32, i32
  }
  func.func @transform_9(%arg0: i32) -> (i32, i32) {
    %c0_i32 = arith.constant 0 : i32
    %c0_i32_0 = arith.constant 0 : i32
    return %arg0, %c0_i32 : i32, i32
  }
}

</mosaic_0001>

<bundles_post_ra>
// kernel: mlp_forward.1
= control target key start
LH: loop header
LB: loop body
LE: loop exit
PB: predicated region body
PF: predicated region fallthrough
CT: control target
= control target key end

     0   :  { %vm1177_vm0 = vcmask 130048   ;;  %vm3975_vm1 = vmmov 0   ;;  %s5142_s1 = inlined_call_operand.vmem [shape: bf16[784,256], index: 1, kind: input, shape index: {}]   ;;  %s5143_s0 = inlined_call_operand.vmem [shape: bf16[200,784], index: 0, kind: input, shape index: {}]   ;;  %s5144_s3 = inlined_call_operand.vmem [shape: bf16[256,128], index: 3, kind: input, shape index: {}]   ;;  %s5145_s2 = inlined_call_operand.vmem [shape: f32[1,256], index: 2, kind: input, shape index: {}]   ;;  %s5146_s5 = inlined_call_operand.vmem [shape: bf16[128,128], index: 5, kind: input, shape index: {}]   ;;  %s5147_s7 = inlined_call_operand.vmem [shape: bf16[128,128], index: 7, kind: input, shape index: {}]   ;;  %s5148_s4 = inlined_call_operand.vmem [shape: f32[1,128], index: 4, kind: input, shape index: {}]   ;;  %s5149_s6 = inlined_call_operand.vmem [shape: f32[1,128], index: 6, kind: input, shape index: {}]   ;;  %s5150_s8 = inlined_call_operand.vmem [shape: f32[1,128], index: 8, kind: input, shape index: {}]   ;;  %s5151_s9 = inlined_call_operand.vmem [shape: bf16[200,128], index: 9, kind: output, shape index: {}]  }
   0x1   :  { %v3667_v0 = vld [vmem:[%s5142_s1 + $0x4] ss:$8 sps:$4 sm:$0xff]   ;;  %v3669_v1 = vld [vmem:[%s5142_s1] ss:$8 sps:$4 sm:$0xff]   ;;  %v3670_v2 = vld [vmem:[%s5142_s1 + $0x14] ss:$8 sps:$4 sm:$0xff]  }
   0x2   :  { %1217 = vmatprep.subr.bf16.mxu0 %v3667_v0  ;;  %v3672_v3 = vld [vmem:[%s5142_s1 + $0x10] ss:$8 sps:$4 sm:$0xff]   ;;  %v3673_v4 = vld [vmem:[%s5142_s1 + $0x24] ss:$8 sps:$4 sm:$0xff]   ;;  %v3675_v5 = vld [vmem:[%s5142_s1 + $0x20] ss:$8 sps:$4 sm:$0xff]  }
   0x3   :  { %1218 = vmatpush1.bf16.msra.mxu0 %v3669_v1  ;;  %v3676_v6 = vld [vmem:[%s5142_s1 + $0x34] ss:$8 sps:$4 sm:$0xff]   ;;  %v3678_v7 = vld [vmem:[%s5142_s1 + $0x30] ss:$8 sps:$4 sm:$0xff]   ;;  %v3679_v8 = vld [vmem:[%s5142_s1 + $0x44] ss:$8 sps:$4 sm:$0xff]  }
   0x4   :  { %1219 = vmatprep.subr.bf16.mxu0 %v3670_v2  ;;  %v3681_v9 = vld [vmem:[%s5142_s1 + $0x40] ss:$8 sps:$4 sm:$0xff]   ;;  %v3682_v10 = vld [vmem:[%s5142_s1 + $0x54] ss:$8 sps:$4 sm:$0xff]   ;;  %v3684_v11 = vld [vmem:[%s5142_s1 + $0x50] ss:$8 sps:$4 sm:$0xff]  }
   0x5   :  { %v3685_v12 = vld [vmem:[%s5142_s1 + $0x64] ss:$8 sps:$4 sm:$0xff]   ;;  %v3687_v14 = vld [vmem:[%s5142_s1 + $0x60] ss:$8 sps:$4 sm:$0xff]   ;;  %v3688_v15 = vld [vmem:[%s5142_s1 + $0x74] ss:$8 sps:$4 sm:$0xff]  }
   0x6   :  { %v3717_v13 = vld [vmem:[%s5143_s0 + $0x4] ss:$28 sps:$4 sm:$0xff]   ;;  %v3690_v16 = vld [vmem:[%s5142_s1 + $0x70] ss:$8 sps:$4 sm:$0xff]   ;;  %v3694_v19 = vld [vmem:[%s5142_s1 + $0x94] ss:$8 sps:$4 sm:$0xff]  }
   0x7   :  { %1220 = vmatpush1.bf16.msra.mxu0 %v3672_v3  ;;  %1249 = vmatprep.mubr.bf16.mxu0 %v3717_v13  ;;  %v3691_v17 = vld [vmem:[%s5142_s1 + $0x84] ss:$8 sps:$4 sm:$0xff]   ;;  %v3693_v18 = vld [vmem:[%s5142_s1 + $0x80] ss:$8 sps:$4 sm:$0xff]   ;;  %v3696_v20 = vld [vmem:[%s5142_s1 + $0x90] ss:$8 sps:$4 sm:$0xff]  }
   0x8   :  { %1221 = vmatprep.subr.bf16.mxu0 %v3673_v4  ;;  %v3697_v21 = vld [vmem:[%s5142_s1 + $0xa4] ss:$8 sps:$4 sm:$0xff]   ;;  %v3699_v22 = vld [vmem:[%s5142_s1 + $0xa0] ss:$8 sps:$4 sm:$0xff]   ;;  %v3700_v23 = vld [vmem:[%s5142_s1 + $0xb4] ss:$8 sps:$4 sm:$0xff]  }
   0x9   :  { %v3702_v24 = vld [vmem:[%s5142_s1 + $0xb0] ss:$8 sps:$4 sm:$0xff]   ;;  %v3703_v25 = vld [vmem:[%s5142_s1 + $0xc4] ss:$8 sps:$4 sm:$0xff]   ;;  %v3705_v26 = vld [vmem:[%s5142_s1 + $0xc0] ss:$8 sps:$4 sm:$0xff]  }
   0xa   :  { %v3706_v27 = vld [vmem:[%s5142_s1 + $0xd4] ss:$8 sps:$4 sm:$0xff]   ;;  %v3708_v28 = vld [vmem:[%s5142_s1 + $0xd0] ss:$8 sps:$4 sm:$0xff]   ;;  %v3709_v29 = vld [vmem:[%s5142_s1 + $0xe4] ss:$8 sps:$4 sm:$0xff]  }
   0xb   :  { %1222 = vmatpush1.bf16.msra.mxu0 %v3675_v5  ;;  %v3711_v30 = vld [vmem:[%s5142_s1 + $0xe0] ss:$8 sps:$4 sm:$0xff]   ;;  %v3712_v31 = vld [vmem:[%s5142_s1 + $0xf4] ss:$8 sps:$4 sm:$0xff]   ;;  %v3714_v32 = vld [vmem:[%s5142_s1 + $0xf0] ss:$8 sps:$4 sm:$0xff]  }
   0xc   :  { %1223 = vmatprep.subr.bf16.mxu0 %v3676_v6  ;;  %v3720_v33 = vld [vmem:[%s5142_s1 + $0x104] ss:$8 sps:$4 sm:$0xff]   ;;  %v3715_v34 = vld [vmem:[%s5143_s0] ss:$28 sps:$4 sm:$0xff]   ;;  %v3723_v38 = vld [vmem:[%s5142_s1 + $0x110] ss:$8 sps:$4 sm:$0xff]  }
   0xd   :  { %v3718_v35 = vld [vmem:[%s5142_s1 + $0x100] ss:$8 sps:$4 sm:$0xff]   ;;  %v3721_v36 = vld [vmem:[%s5143_s0 + $0x3c] ss:$28 sps:$4 sm:$0xff]   ;;  %v3729_v39 = vld [vmem:[%s5142_s1 + $0x124] ss:$8 sps:$4 sm:$0xff]  }
   0xe   :  { %v3725_v37 = vld [vmem:[%s5142_s1 + $0x114] ss:$8 sps:$4 sm:$0xff]   ;;  %v3727_v41 = vld [vmem:[%s5142_s1 + $0x120] ss:$8 sps:$4 sm:$0xff]   ;;  %v3733_v44 = vld [vmem:[%s5142_s1 + $0x130] ss:$8 sps:$4 sm:$0xff]  }
   0xf   :  { %1224 = vmatpush1.bf16.msra.mxu0 %v3678_v7  ;;  %v3726_v40 = vld [vmem:[%s5143_s0 + $0x38] ss:$28 sps:$4 sm:$0xff]   ;;  %v3732_v45 = vld [vmem:[%s5143_s0 + $0x70] ss:$28 sps:$4 sm:$0xff]   ;;  %v3739_v48 = vld [vmem:[%s5142_s1 + $0x140] ss:$8 sps:$4 sm:$0xff]  }
  0x10   :  { %1225 = vmatprep.subr.bf16.mxu0 %v3679_v8  ;;  %v3730_v42 = vld [vmem:[%s5143_s0 + $0x74] ss:$28 sps:$4 sm:$0xff]   ;;  %v3741_v46 = vld [vmem:[%s5142_s1 + $0x144] ss:$8 sps:$4 sm:$0xff]   ;;  %v3750_v54 = vld [vmem:[%s5142_s1 + $0x160] ss:$8 sps:$4 sm:$0xff]  }
  0x11   :  { %v3735_v43 = vld [vmem:[%s5142_s1 + $0x134] ss:$8 sps:$4 sm:$0xff]   ;;  %v3736_v47 = vld [vmem:[%s5143_s0 + $0xac] ss:$28 sps:$4 sm:$0xff]   ;;  %v3745_v50 = vld [vmem:[%s5142_s1 + $0x150] ss:$8 sps:$4 sm:$0xff]  }
  0x12   :  { %v3747_v49 = vld [vmem:[%s5142_s1 + $0x154] ss:$8 sps:$4 sm:$0xff]   ;;  %v3752_v51 = vld [vmem:[%s5142_s1 + $0x164] ss:$8 sps:$4 sm:$0xff]   ;;  %v3754_v56 = vld [vmem:[%s5142_s1 + $0x170] ss:$8 sps:$4 sm:$0xff]  }
  0x13   :  { %1226 = vmatpush1.bf16.msra.mxu0 %v3681_v9  ;;  %v3738_v52 = vld [vmem:[%s5143_s0 + $0xa8] ss:$28 sps:$4 sm:$0xff]   ;;  %v3756_v55 = vld [vmem:[%s5142_s1 + $0x174] ss:$8 sps:$4 sm:$0xff]   ;;  %v3766_v62 = vld [vmem:[%s5142_s1 + $0x190] ss:$8 sps:$4 sm:$0xff]  }
  0x14   :  { %1227 = vmatprep.subr.bf16.mxu0 %v3682_v10  ;;  %v3742_v53 = vld [vmem:[%s5143_s0 + $0xe4] ss:$28 sps:$4 sm:$0xff]   ;;  %v3748_v59 = vld [vmem:[%s5143_s0 + $0x11c] ss:$28 sps:$4 sm:$0xff]   ;;  %v3757_v1 = vld [vmem:[%s5143_s0 + $0x154] ss:$28 sps:$4 sm:$0xff]  }
  0x15   :  { %v3762_v57 = vld [vmem:[%s5142_s1 + $0x184] ss:$8 sps:$4 sm:$0xff]   ;;  %v3744_v58 = vld [vmem:[%s5143_s0 + $0xe0] ss:$28 sps:$4 sm:$0xff]   ;;  %v3753_v0 = vld [vmem:[%s5143_s0 + $0x118] ss:$28 sps:$4 sm:$0xff]  }
  0x16   :  { %v3760_v60 = vld [vmem:[%s5142_s1 + $0x180] ss:$8 sps:$4 sm:$0xff]   ;;  %v3768_v61 = vld [vmem:[%s5142_s1 + $0x194] ss:$8 sps:$4 sm:$0xff]   ;;  %v3774_v63 = vld [vmem:[%s5142_s1 + $0x1a4] ss:$8 sps:$4 sm:$0xff]  }
  0x17   :  { %1228 = vmatpush1.bf16.msra.mxu0 %v3684_v11  ;;  %v3772_v2 = vld [vmem:[%s5142_s1 + $0x1a0] ss:$8 sps:$4 sm:$0xff]   ;;  %v3780_v3 = vld [vmem:[%s5142_s1 + $0x1b4] ss:$8 sps:$4 sm:$0xff]   ;;  %v3778_v4 = vld [vmem:[%s5142_s1 + $0x1b0] ss:$8 sps:$4 sm:$0xff]  }
  0x18   :  { %1229 = vmatprep.subr.bf16.mxu0 %v3685_v12  ;;  %v3783_v5 = vld [vmem:[%s5142_s1 + $0x1c4] ss:$8 sps:$4 sm:$0xff]   ;;  %v3781_v8 = vld [vmem:[%s5142_s1 + $0x1c0] ss:$8 sps:$4 sm:$0xff]   ;;  %v3789_v9 = vld [vmem:[%s5142_s1 + $0x1d4] ss:$8 sps:$4 sm:$0xff]  }
  0x19   :  { %v3759_v6 = vld [vmem:[%s5143_s0 + $0x150] ss:$28 sps:$4 sm:$0xff]   ;;  %v3765_v12 = vld [vmem:[%s5143_s0 + $0x188] ss:$28 sps:$4 sm:$0xff]  }
  0x1a   :  { %v3763_v7 = vld [vmem:[%s5143_s0 + $0x18c] ss:$28 sps:$4 sm:$0xff]   ;;  %v3787_v10 = vld [vmem:[%s5142_s1 + $0x1d0] ss:$8 sps:$4 sm:$0xff]   ;;  %v3769_v13 = vld [vmem:[%s5143_s0 + $0x1c4] ss:$28 sps:$4 sm:$0xff]  }
  0x1b   :  { %1230 = vmatpush1.bf16.msra.mxu0 %v3687_v14  ;;  %v3795_v11 = vld [vmem:[%s5142_s1 + $0x1e4] ss:$8 sps:$4 sm:$0xff]   ;;  %v3793_v14 = vld [vmem:[%s5142_s1 + $0x1e0] ss:$8 sps:$4 sm:$0xff]  }
  0x1c   :  { %1231 = vmatprep.subr.bf16.mxu0 %v3688_v15  ;;  %v3800_v15 = vld [vmem:[%s5142_s1 + $0x1f4] ss:$8 sps:$4 sm:$0xff]  }
  0x1f   :  { %1232 = vmatpush1.bf16.msra.mxu0 %v3690_v16  ;;  %v3798_v16 = vld [vmem:[%s5142_s1 + $0x1f0] ss:$8 sps:$4 sm:$0xff]  }
  0x20   :  { %1233 = vmatprep.subr.bf16.mxu0 %v3691_v17  ;;  %v3806_v17 = vld [vmem:[%s5142_s1 + $0x204] ss:$8 sps:$4 sm:$0xff]  }
  0x23   :  { %1234 = vmatpush1.bf16.msra.mxu0 %v3693_v18  ;;  %v3771_v18 = vld [vmem:[%s5143_s0 + $0x1c0] ss:$28 sps:$4 sm:$0xff]  }
  0x24   :  { %1235 = vmatprep.subr.bf16.mxu0 %v3694_v19  ;;  %v3775_v19 = vld [vmem:[%s5143_s0 + $0x1fc] ss:$28 sps:$4 sm:$0xff]  }
  0x27   :  { %1236 = vmatpush1.bf16.msra.mxu0 %v3696_v20  ;;  %v3777_v20 = vld [vmem:[%s5143_s0 + $0x1f8] ss:$28 sps:$4 sm:$0xff]  }
  0x28   :  { %1237 = vmatprep.subr.bf16.mxu0 %v3697_v21  ;;  %v3784_v21 = vld [vmem:[%s5143_s0 + $0x234] ss:$28 sps:$4 sm:$0xff]  }
  0x2b   :  { %1238 = vmatpush1.bf16.msra.mxu0 %v3699_v22  ;;  %v3786_v22 = vld [vmem:[%s5143_s0 + $0x230] ss:$28 sps:$4 sm:$0xff]  }
  0x2c   :  { %1239 = vmatprep.subr.bf16.mxu0 %v3700_v23  ;;  %v3790_v23 = vld [vmem:[%s5143_s0 + $0x26c] ss:$28 sps:$4 sm:$0xff]  }
  0x2f   :  { %1240 = vmatpush1.bf16.msra.mxu0 %v3702_v24  ;;  %v4293_v24 = vld [vmem:[%s5142_s1 + $0x300] ss:$8 sps:$4 sm:$0xff]  }
  0x30   :  { %1241 = vmatprep.subr.bf16.mxu0 %v3703_v25  ;;  %v4298_v25 = vld [vmem:[%s5142_s1 + $0x304] ss:$8 sps:$4 sm:$0xff]  }
  0x31   :  { %3458 = vmatprep.subr.bf16.mxu1 %v4298_v25 }
  0x32   :  { %3459 = vmatpush1.bf16.msra.mxu1 %v4293_v24 }
  0x33   :  { %1242 = vmatpush1.bf16.msra.mxu0 %v3705_v26  ;;  %v129_v26 = vld [vmem:[%s5143_s0 + $0x2a0] sm:$0xff] }
  0x34   :  { %1243 = vmatprep.subr.bf16.mxu0 %v3706_v27  ;;  %v3792_v27 = vld [vmem:[%s5143_s0 + $0x268] ss:$28 sps:$4 sm:$0xff]  }
  0x37   :  { %1244 = vmatpush1.bf16.msra.mxu0 %v3708_v28  ;;  %v2913_v28 = vcombine.high %v129_v26, %v129_v26 }
  0x38   :  { %1245 = vmatprep.subr.bf16.mxu0 %v3709_v29  ;;  %v2912_v29 = vcombine.low %v129_v26, %v129_v26  ;;  %v3861_v26 = vld [vmem:[%s5143_s0 + $0x204] ss:$28 sps:$4 sm:$0xff]  }
  0x3b   :  { %1246 = vmatpush1.bf16.msra.mxu0 %v3711_v30  ;;  %v3803_v30 = vld [vmem:[%s5143_s0 + $0xc] ss:$28 sps:$4 sm:$0xff]  }
  0x3c   :  { %1247 = vmatprep.subr.bf16.mxu0 %v3712_v31  ;;  %v3801_v31 = vld [vmem:[%s5143_s0 + $0x8] ss:$28 sps:$4 sm:$0xff]  }
  0x3f   :  { %1248 = vmatpush1.bf16.msra.mxu0 %v3714_v32  ;;  %v3804_v32 = vld [vmem:[%s5142_s1 + $0x200] ss:$8 sps:$4 sm:$0xff]  }
  0x40   :  { %1378 = vmatprep.subr.bf16.mxu0 %v3720_v33  ;;  %v3807_v33 = vld [vmem:[%s5143_s0 + $0x44] ss:$28 sps:$4 sm:$0xff]  }
  0x42   :  { %1250 = vmatmul.mubr.bf16.vlgmr.msra.gmra.mrb[0].mxu0 %v3715_v34  ;;  %v3811_v34 = vld [vmem:[%s5142_s1 + $0x214] ss:$8 sps:$4 sm:$0xff]  }
  0x43   :  { %1379 = vmatpush1.bf16.msra.mxu0 %v3718_v35  ;;  %1259 = vmatprep.mubr.bf16.mxu0 %v3721_v36  ;;  %v3902_v35 = vld [vmem:[%s5143_s0 + $0xc0] ss:$28 sps:$4 sm:$0xff]   ;;  %v3809_v36 = vld [vmem:[%s5142_s1 + $0x210] ss:$8 sps:$4 sm:$0xff]  }
  0x44   :  { %1380 = vmatprep.subr.bf16.mxu0 %v3725_v37  ;;  %v3815_v37 = vld [vmem:[%s5142_s1 + $0x224] ss:$8 sps:$4 sm:$0xff]  }
  0x47   :  { %1381 = vmatpush1.bf16.msra.mxu0 %v3723_v38  ;;  %v3973_v38 = vmov 0  }
  0x48   :  { %1382 = vmatprep.subr.bf16.mxu0 %v3729_v39  ;;  %1762 = vmatprep.mubr.bf16.mxu1 %v3973_v38  ;;  %v3812_v39 = vld [vmem:[%s5143_s0 + $0x40] ss:$28 sps:$4 sm:$0xff]  }
  0x49   :  { %3020 = vmatmul.mubr.msk.bf16.vlgmr.msra.gmra.mrb[0].mxu1 %vm1177_vm0, %v3902_v35 }
  0x4a   :  { %1260 = vmatmul.mubr.bf16.gmra.mrb[4].mxu0 %v3726_v40  ;;  %1772 = vmatprep.mubr.bf16.mxu1 %v3973_v38  ;;  %v3813_v40 = vld [vmem:[%s5142_s1 + $0x220] ss:$8 sps:$4 sm:$0xff]  }
  0x4b   :  { %1383 = vmatpush1.bf16.msra.mxu0 %v3727_v41  ;;  %1269 = vmatprep.mubr.bf16.mxu0 %v3730_v42  ;;  %v3816_v41 = vld [vmem:[%s5143_s0 + $0x7c] ss:$28 sps:$4 sm:$0xff]  }
  0x4c   :  { %1384 = vmatprep.subr.bf16.mxu0 %v3735_v43  ;;  %v3821_v42 = vld [vmem:[%s5142_s1 + $0x234] ss:$8 sps:$4 sm:$0xff]  }
  0x4d   :  { %v3906_v43 = vld [vmem:[%s5143_s0 + $0xf8] ss:$28 sps:$4 sm:$0xff]  }
  0x4f   :  { %1385 = vmatpush1.bf16.msra.mxu0 %v3733_v44  ;;  %v3819_v44 = vld [vmem:[%s5142_s1 + $0x230] ss:$8 sps:$4 sm:$0xff]  }
  0x50   :  { %1386 = vmatprep.subr.bf16.mxu0 %v3741_v46  ;;  %v3818_v46 = vld [vmem:[%s5143_s0 + $0x78] ss:$28 sps:$4 sm:$0xff]  }
  0x51   :  { %3021 = vmatmul.mubr.msk.bf16.gmra.mrb[4].mxu1 %vm1177_vm0, %v3906_v43  ;;  %v3899_v43 = vld [vmem:[%s5143_s0 + $0xbc] ss:$28 sps:$4 sm:$0xff]  }
  0x52   :  { %1270 = vmatmul.mubr.bf16.gmra.mrb[8].mxu0 %v3732_v45  ;;  %v3827_v45 = vld [vmem:[%s5142_s1 + $0x244] ss:$8 sps:$4 sm:$0xff]   ;;  %1782 = vmatprep.mubr.bf16.mxu1 %v3973_v38 }
  0x53   :  { %1279 = vmatprep.mubr.bf16.mxu0 %v3736_v47  ;;  %1387 = vmatpush1.bf16.msra.mxu0 %v3739_v48  ;;  %v3822_v47 = vld [vmem:[%s5143_s0 + $0xb4] ss:$28 sps:$4 sm:$0xff]   ;;  %v3825_v48 = vld [vmem:[%s5142_s1 + $0x240] ss:$8 sps:$4 sm:$0xff]  }
  0x54   :  { %1388 = vmatprep.subr.bf16.mxu0 %v3747_v49  ;;  %v3833_v49 = vld [vmem:[%s5142_s1 + $0x254] ss:$8 sps:$4 sm:$0xff]  }
  0x57   :  { %1389 = vmatpush1.bf16.msra.mxu0 %v3745_v50  ;;  %v3910_v50 = vld [vmem:[%s5143_s0 + $0x130] ss:$28 sps:$4 sm:$0xff]  }
  0x58   :  { %1390 = vmatprep.subr.bf16.mxu0 %v3752_v51  ;;  %v3831_v51 = vld [vmem:[%s5142_s1 + $0x250] ss:$8 sps:$4 sm:$0xff]  }
  0x59   :  { %3022 = vmatmul.mubr.msk.bf16.gmra.mrb[8].mxu1 %vm1177_vm0, %v3910_v50  ;;  %v3915_v50 = vld [vmem:[%s5143_s0 + $0x19c] ss:$28 sps:$4 sm:$0xff]  }
  0x5a   :  { %1280 = vmatmul.mubr.bf16.gmra.mrb[12].mxu0 %v3738_v52  ;;  %v3838_v52 = vld [vmem:[%s5142_s1 + $0x264] ss:$8 sps:$4 sm:$0xff]   ;;  %1792 = vmatprep.mubr.bf16.mxu1 %v3973_v38 }
  0x5b   :  { %1289 = vmatprep.mubr.bf16.mxu0 %v3742_v53  ;;  %1391 = vmatpush1.bf16.msra.mxu0 %v3750_v54  ;;  %v3824_v53 = vld [vmem:[%s5143_s0 + $0xb0] ss:$28 sps:$4 sm:$0xff]  }
  0x5c   :  { %1392 = vmatprep.subr.bf16.mxu0 %v3756_v55  ;;  %v3828_v54 = vld [vmem:[%s5143_s0 + $0xec] ss:$28 sps:$4 sm:$0xff]  }
  0x5d   :  { %v3836_v55 = vld [vmem:[%s5142_s1 + $0x260] ss:$8 sps:$4 sm:$0xff]  }
  0x5f   :  { %1393 = vmatpush1.bf16.msra.mxu0 %v3754_v56  ;;  %v3842_v56 = vld [vmem:[%s5142_s1 + $0x274] ss:$8 sps:$4 sm:$0xff]  }
  0x60   :  { %1394 = vmatprep.subr.bf16.mxu0 %v3762_v57  ;;  %v3914_v57 = vld [vmem:[%s5143_s0 + $0x168] ss:$28 sps:$4 sm:$0xff]  }
  0x61   :  { %3023 = vmatmul.mubr.msk.bf16.gmra.mrb[12].mxu1 %vm1177_vm0, %v3914_v57  ;;  %v3929_v57 = vld [vmem:[%s5143_s0 + $0x240] ss:$28 sps:$4 sm:$0xff]  }
  0x62   :  { %1290 = vmatmul.mubr.bf16.gmra.mrb[16].mxu0 %v3744_v58  ;;  %v3840_v58 = vld [vmem:[%s5142_s1 + $0x270] ss:$8 sps:$4 sm:$0xff]   ;;  %1802 = vmatprep.mubr.bf16.mxu1 %v3973_v38 }
  0x63   :  { %1299 = vmatprep.mubr.bf16.mxu0 %v3748_v59  ;;  %1395 = vmatpush1.bf16.msra.mxu0 %v3760_v60  ;;  %v3848_v59 = vld [vmem:[%s5142_s1 + $0x284] ss:$8 sps:$4 sm:$0xff]  }
  0x64   :  { %1396 = vmatprep.subr.bf16.mxu0 %v3768_v61  ;;  %v3830_v60 = vld [vmem:[%s5143_s0 + $0xe8] ss:$28 sps:$4 sm:$0xff]  }
  0x65   :  { %v3834_v61 = vld [vmem:[%s5143_s0 + $0x124] ss:$28 sps:$4 sm:$0xff]  }
  0x67   :  { %1397 = vmatpush1.bf16.msra.mxu0 %v3766_v62  ;;  %v3846_v62 = vld [vmem:[%s5142_s1 + $0x280] ss:$8 sps:$4 sm:$0xff]  }
  0x68   :  { %1398 = vmatprep.subr.bf16.mxu0 %v3774_v63  ;;  %v3854_v63 = vld [vmem:[%s5142_s1 + $0x294] ss:$8 sps:$4 sm:$0xff]  }
  0x6a   :  { %1300 = vmatmul.mubr.bf16.gmra.mrb[20].mxu0 %v3753_v0  ;;  %v3918_v0 = vld [vmem:[%s5143_s0 + $0x1a0] ss:$28 sps:$4 sm:$0xff]  }
  0x6b   :  { %1309 = vmatprep.mubr.bf16.mxu0 %v3757_v1  ;;  %1399 = vmatpush1.bf16.msra.mxu0 %v3772_v2  ;;  %v3852_v1 = vld [vmem:[%s5142_s1 + $0x290] ss:$8 sps:$4 sm:$0xff]   ;;  %v3860_v2 = vld [vmem:[%s5142_s1 + $0x2a4] ss:$8 sps:$4 sm:$0xff]  }
  0x6c   :  { %1400 = vmatprep.subr.bf16.mxu0 %v3780_v3  ;;  %3024 = vmatmul.mubr.msk.bf16.gmra.mrb[16].mxu1 %vm1177_vm0, %v3918_v0  ;;  %v3839_v3 = vld [vmem:[%s5143_s0 + $0x120] ss:$28 sps:$4 sm:$0xff]   ;;  %v3939_v0 = vld [vmem:[%s5143_s0 + $0x50] ss:$28 sps:$4 sm:$0xff]  }
  0x6d   :  { %1812 = vmatprep.mubr.bf16.mxu1 %v3973_v38 }
  0x6f   :  { %1401 = vmatpush1.bf16.msra.mxu0 %v3778_v4  ;;  %v3843_v4 = vld [vmem:[%s5143_s0 + $0x15c] ss:$28 sps:$4 sm:$0xff]  }
  0x70   :  { %1402 = vmatprep.subr.bf16.mxu0 %v3783_v5  ;;  %v3858_v5 = vld [vmem:[%s5142_s1 + $0x2a0] ss:$8 sps:$4 sm:$0xff]  }
  0x72   :  { %1310 = vmatmul.mubr.bf16.gmra.mrb[24].mxu0 %v3759_v6  ;;  %v3866_v6 = vld [vmem:[%s5142_s1 + $0x2b4] ss:$8 sps:$4 sm:$0xff]  }
  0x73   :  { %1319 = vmatprep.mubr.bf16.mxu0 %v3763_v7  ;;  %1403 = vmatpush1.bf16.msra.mxu0 %v3781_v8  ;;  %v3922_v7 = vld [vmem:[%s5143_s0 + $0x1d8] ss:$28 sps:$4 sm:$0xff]  }
  0x74   :  { %1404 = vmatprep.subr.bf16.mxu0 %v3789_v9  ;;  %v3864_v8 = vld [vmem:[%s5142_s1 + $0x2b0] ss:$8 sps:$4 sm:$0xff]   ;;  %v3869_v9 = vld [vmem:[%s5142_s1 + $0x2c4] ss:$8 sps:$4 sm:$0xff]   ;;  %3025 = vmatmul.mubr.msk.bf16.gmra.mrb[20].mxu1 %vm1177_vm0, %v3922_v7 }
  0x75   :  { %1822 = vmatprep.mubr.bf16.mxu1 %v3973_v38 }
  0x77   :  { %1405 = vmatpush1.bf16.msra.mxu0 %v3787_v10  ;;  %v3845_v10 = vld [vmem:[%s5143_s0 + $0x158] ss:$28 sps:$4 sm:$0xff]  }
  0x78   :  { %1406 = vmatprep.subr.bf16.mxu0 %v3795_v11  ;;  %v3849_v11 = vld [vmem:[%s5143_s0 + $0x194] ss:$28 sps:$4 sm:$0xff]  }
  0x7a   :  { %1320 = vmatmul.mubr.bf16.gmra.mrb[28].mxu0 %v3765_v12  ;;  %v3867_v12 = vld [vmem:[%s5142_s1 + $0x2c0] ss:$8 sps:$4 sm:$0xff]  }
  0x7b   :  { %1329 = vmatprep.mubr.bf16.mxu0 %v3769_v13  ;;  %1407 = vmatpush1.bf16.msra.mxu0 %v3793_v14  ;;  %v3875_v13 = vld [vmem:[%s5142_s1 + $0x2d4] ss:$8 sps:$4 sm:$0xff]   ;;  %v3926_v14 = vld [vmem:[%s5143_s0 + $0x210] ss:$28 sps:$4 sm:$0xff]  }
  0x7c   :  { %1408 = vmatprep.subr.bf16.mxu0 %v3800_v15  ;;  %v3873_v15 = vld [vmem:[%s5142_s1 + $0x2d0] ss:$8 sps:$4 sm:$0xff]   ;;  %3026 = vmatmul.mubr.msk.bf16.gmra.mrb[24].mxu1 %vm1177_vm0, %v3926_v14 }
  0x7d   :  { %1832 = vmatprep.mubr.bf16.mxu1 %v3973_v38 }
  0x7f   :  { %1409 = vmatpush1.bf16.msra.mxu0 %v3798_v16  ;;  %v3881_v16 = vld [vmem:[%s5142_s1 + $0x2e4] ss:$8 sps:$4 sm:$0xff]  }
  0x80   :  { %1539 = vmatprep.subr.bf16.mxu0 %v3806_v17  ;;  %v3851_v17 = vld [vmem:[%s5143_s0 + $0x190] ss:$28 sps:$4 sm:$0xff]  }
  0x82   :  { %1330 = vmatmul.mubr.bf16.gmra.mrb[32].mxu0 %v3771_v18  ;;  %v3855_v18 = vld [vmem:[%s5143_s0 + $0x1cc] ss:$28 sps:$4 sm:$0xff]  }
  0x83   :  { %1339 = vmatprep.mubr.bf16.mxu0 %v3775_v19  ;;  %v3879_v19 = vld [vmem:[%s5142_s1 + $0x2e0] ss:$8 sps:$4 sm:$0xff]  }
  0x8a   :  { %1340 = vmatmul.mubr.bf16.gmra.mrb[36].mxu0 %v3777_v20  ;;  %v3886_v20 = vld [vmem:[%s5142_s1 + $0x2f4] ss:$8 sps:$4 sm:$0xff]  }
  0x8b   :  { %1349 = vmatprep.mubr.bf16.mxu0 %v3784_v21  ;;  %v3930_v21 = vld [vmem:[%s5143_s0 + $0x248] ss:$28 sps:$4 sm:$0xff]  }
  0x8c   :  { %3027 = vmatmul.mubr.msk.bf16.gmra.mrb[28].mxu1 %vm1177_vm0, %v3930_v21  ;;  %v3945_v21 = vld [vmem:[%s5144_s3 + $0x50] sm:$0xff]  }
  0x8d   :  { %1842 = vmatprep.mubr.bf16.mxu1 %v3973_v38 }
  0x92   :  { %1350 = vmatmul.mubr.bf16.gmra.mrb[40].mxu0 %v3786_v22  ;;  %v3884_v22 = vld [vmem:[%s5142_s1 + $0x2f0] ss:$8 sps:$4 sm:$0xff]  }
  0x93   :  { %1359 = vmatprep.mubr.bf16.mxu0 %v3790_v23  ;;  %v3857_v23 = vld [vmem:[%s5143_s0 + $0x1c8] ss:$28 sps:$4 sm:$0xff]  }
  0x9a   :  { %1360 = vmatmul.mubr.bf16.gmra.mrb[44].mxu0 %v3792_v27  ;;  %v3934_v27 = vld [vmem:[%s5143_s0 + $0x280] ss:$28 sps:$4 sm:$0xff]  }
  0x9b   :  { %1369 = vmatprep.mubr.bf16.mxu0 %v2913_v28  ;;  %3028 = vmatmul.mubr.msk.bf16.gmra.mrb[32].mxu1 %vm1177_vm0, %v3934_v27  ;;  %v3863_v28 = vld [vmem:[%s5143_s0 + $0x200] ss:$28 sps:$4 sm:$0xff]  }
  0x9c   :  { %1852 = vmatprep.mubr.bf16.mxu1 %v3973_v38 }
  0xa2   :  { %1370 = vmatmul.mubr.bf16.gmra.mrb[48].mxu0 %v2912_v29  ;;  %v3870_v29 = vld [vmem:[%s5143_s0 + $0x23c] ss:$28 sps:$4 sm:$0xff]  }
  0xa3   :  { %1410 = vmatprep.mubr.bf16.mxu0 %v3803_v30  ;;  %v3872_v30 = vld [vmem:[%s5143_s0 + $0x238] ss:$28 sps:$4 sm:$0xff]  }
  0xaa   :  { %1411 = vmatmul.mubr.bf16.vlgmr.msra.gmra.mrb[0].mxu0 %v3801_v31  ;;  %v3876_v31 = vld [vmem:[%s5143_s0 + $0x274] ss:$28 sps:$4 sm:$0xff]  }
  0xab   :  { %1540 = vmatpush1.bf16.msra.mxu0 %v3804_v32  ;;  %1420 = vmatprep.mubr.bf16.mxu0 %v3807_v33  ;;  %v130_v32 = vld [vmem:[%s5143_s0 + $0x2a8] sm:$0xff] }
  0xac   :  { %1541 = vmatprep.subr.bf16.mxu0 %v3811_v34  ;;  %v3878_v33 = vld [vmem:[%s5143_s0 + $0x270] ss:$28 sps:$4 sm:$0xff]   ;;  %v2915_v34 = vcombine.high %v130_v32, %v130_v32  ;;  %v2914_v35 = vcombine.low %v130_v32, %v130_v32 }
  0xaf   :  { %1542 = vmatpush1.bf16.msra.mxu0 %v3809_v36  ;;  %v3889_v36 = vld [vmem:[%s5143_s0 + $0x14] ss:$28 sps:$4 sm:$0xff]  }
  0xb0   :  { %1543 = vmatprep.subr.bf16.mxu0 %v3815_v37  ;;  %v3887_v37 = vld [vmem:[%s5143_s0 + $0x10] ss:$28 sps:$4 sm:$0xff]  }
  0xb2   :  { %1421 = vmatmul.mubr.bf16.gmra.mrb[4].mxu0 %v3812_v39  ;;  %v3893_v39 = vld [vmem:[%s5143_s0 + $0x4c] ss:$28 sps:$4 sm:$0xff]  }
  0xb3   :  { %1544 = vmatpush1.bf16.msra.mxu0 %v3813_v40  ;;  %1430 = vmatprep.mubr.bf16.mxu0 %v3816_v41  ;;  %v3895_v40 = vld [vmem:[%s5143_s0 + $0x48] ss:$28 sps:$4 sm:$0xff]  }
  0xb4   :  { %1545 = vmatprep.subr.bf16.mxu0 %v3821_v42  ;;  %v3896_v41 = vld [vmem:[%s5143_s0 + $0x84] ss:$28 sps:$4 sm:$0xff]  }
  0xb5   :  { %v3898_v42 = vld [vmem:[%s5143_s0 + $0x80] ss:$28 sps:$4 sm:$0xff]  }
  0xb7   :  { %1546 = vmatpush1.bf16.msra.mxu0 %v3819_v44  ;;  %v3903_v44 = vld [vmem:[%s5143_s0 + $0xf4] ss:$28 sps:$4 sm:$0xff]  }
  0xb8   :  { %1547 = vmatprep.subr.bf16.mxu0 %v3827_v45  ;;  %v3905_v45 = vld [vmem:[%s5143_s0 + $0xf0] ss:$28 sps:$4 sm:$0xff]  }
  0xba   :  { %1431 = vmatmul.mubr.bf16.gmra.mrb[8].mxu0 %v3818_v46  ;;  %v3907_v46 = vld [vmem:[%s5143_s0 + $0x12c] ss:$28 sps:$4 sm:$0xff]  }
  0xbb   :  { %1440 = vmatprep.mubr.bf16.mxu0 %v3822_v47  ;;  %1548 = vmatpush1.bf16.msra.mxu0 %v3825_v48  ;;  %v3909_v47 = vld [vmem:[%s5143_s0 + $0x128] ss:$28 sps:$4 sm:$0xff]  }
  0xbc   :  { %1549 = vmatprep.subr.bf16.mxu0 %v3833_v49  ;;  %v3911_v48 = vld [vmem:[%s5143_s0 + $0x164] ss:$28 sps:$4 sm:$0xff]  }
  0xbd   :  { %v3913_v49 = vld [vmem:[%s5143_s0 + $0x160] ss:$28 sps:$4 sm:$0xff]  }
  0xbf   :  { %1550 = vmatpush1.bf16.msra.mxu0 %v3831_v51  ;;  %v3917_v51 = vld [vmem:[%s5143_s0 + $0x198] ss:$28 sps:$4 sm:$0xff]  }
  0xc0   :  { %1551 = vmatprep.subr.bf16.mxu0 %v3838_v52  ;;  %v3919_v52 = vld [vmem:[%s5143_s0 + $0x1d4] ss:$28 sps:$4 sm:$0xff]  }
  0xc2   :  { %1441 = vmatmul.mubr.bf16.gmra.mrb[12].mxu0 %v3824_v53  ;;  %v3921_v53 = vld [vmem:[%s5143_s0 + $0x1d0] ss:$28 sps:$4 sm:$0xff]  }
  0xc3   :  { %1450 = vmatprep.mubr.bf16.mxu0 %v3828_v54  ;;  %1552 = vmatpush1.bf16.msra.mxu0 %v3836_v55  ;;  %v3923_v54 = vld [vmem:[%s5143_s0 + $0x20c] ss:$28 sps:$4 sm:$0xff]  }
  0xc4   :  { %1553 = vmatprep.subr.bf16.mxu0 %v3842_v56  ;;  %v3925_v55 = vld [vmem:[%s5143_s0 + $0x208] ss:$28 sps:$4 sm:$0xff]  }
  0xc5   :  { %v3927_v56 = vld [vmem:[%s5143_s0 + $0x244] ss:$28 sps:$4 sm:$0xff]  }
  0xc7   :  { %1554 = vmatpush1.bf16.msra.mxu0 %v3840_v58  ;;  %v3931_v58 = vld [vmem:[%s5143_s0 + $0x27c] ss:$28 sps:$4 sm:$0xff]  }
  0xc8   :  { %1555 = vmatprep.subr.bf16.mxu0 %v3848_v59  ;;  %v131_v59 = vld [vmem:[%s5143_s0 + $0x2b0] sm:$0xff] }
  0xca   :  { %1451 = vmatmul.mubr.bf16.gmra.mrb[16].mxu0 %v3830_v60  ;;  %v3933_v60 = vld [vmem:[%s5143_s0 + $0x278] ss:$28 sps:$4 sm:$0xff]  }
  0xcb   :  { %1460 = vmatprep.mubr.bf16.mxu0 %v3834_v61  ;;  %1556 = vmatpush1.bf16.msra.mxu0 %v3846_v62  ;;  %v2917_v61 = vcombine.high %v131_v59, %v131_v59  ;;  %v2916_v62 = vcombine.low %v131_v59, %v131_v59 }
  0xcc   :  { %1557 = vmatprep.subr.bf16.mxu0 %v3854_v63  ;;  %v3938_v63 = vld [vmem:[%s5143_s0 + $0x18] ss:$28 sps:$4 sm:$0xff]  }
  0xcf   :  { %1558 = vmatpush1.bf16.msra.mxu0 %v3852_v1 }
  0xd0   :  { %1559 = vmatprep.subr.bf16.mxu0 %v3860_v2 }
  0xd2   :  { %1461 = vmatmul.mubr.bf16.gmra.mrb[20].mxu0 %v3839_v3 }
  0xd3   :  { %1470 = vmatprep.mubr.bf16.mxu0 %v3843_v4  ;;  %1560 = vmatpush1.bf16.msra.mxu0 %v3858_v5  ;;  %v3940_v5 = vld [vmem:[%s5143_s0 + $0x88] ss:$28 sps:$4 sm:$0xff]  }
  0xd4   :  { %1561 = vmatprep.subr.bf16.mxu0 %v3866_v6 }
  0xd7   :  { %1562 = vmatpush1.bf16.msra.mxu0 %v3864_v8 }
  0xd8   :  { %1563 = vmatprep.subr.bf16.mxu0 %v3869_v9 }
  0xda   :  { %1471 = vmatmul.mubr.bf16.gmra.mrb[24].mxu0 %v3845_v10  ;;  %v3942_v10 = vld [vmem:[%s5144_s3] sm:$0xff]  }
  0xdb   :  { %1480 = vmatprep.mubr.bf16.mxu0 %v3849_v11  ;;  %1564 = vmatpush1.bf16.msra.mxu0 %v3867_v12 }
  0xdc   :  { %1565 = vmatprep.subr.bf16.mxu0 %v3875_v13 }
  0xdf   :  { %1566 = vmatpush1.bf16.msra.mxu0 %v3873_v15  ;;  %v3943_v15 = vld [vmem:[%s5144_s3 + $0x48] sm:$0xff]  }
  0xe0   :  { %1567 = vmatprep.subr.bf16.mxu0 %v3881_v16  ;;  %v3944_v16 = vld [vmem:[%s5144_s3 + $0x8] sm:$0xff]  }
  0xe2   :  { %1481 = vmatmul.mubr.bf16.gmra.mrb[28].mxu0 %v3851_v17 }
  0xe3   :  { %1490 = vmatprep.mubr.bf16.mxu0 %v3855_v18  ;;  %1568 = vmatpush1.bf16.msra.mxu0 %v3879_v19 }
  0xe4   :  { %1569 = vmatprep.subr.bf16.mxu0 %v3886_v20 }
  0xe7   :  { %1570 = vmatpush1.bf16.msra.mxu0 %v3884_v22  ;;  %v3946_v22 = vld [vmem:[%s5144_s3 + $0x10] sm:$0xff]  }
  0xe8   :  { %1700 = vmatprep.subr.bf16.mxu0 %v4298_v25  ;;  %v3937_v25 = vld [vmem:[%s5143_s0 + $0x2b8] ss:$0 sps:$4 sm:$0xff]  }
  0xe9   :  { %3029 = vmatmul.mubr.msk.bf16.gmra.mrb[36].mxu1 %vm1177_vm0, %v3937_v25 }
  0xea   :  { %1491 = vmatmul.mubr.bf16.gmra.mrb[32].mxu0 %v3857_v23 }
  0xeb   :  { %1500 = vmatprep.mubr.bf16.mxu0 %v3861_v26 }
  0xf2   :  { %1501 = vmatmul.mubr.bf16.gmra.mrb[36].mxu0 %v3863_v28 }
  0xf3   :  { %1510 = vmatprep.mubr.bf16.mxu0 %v3870_v29  ;;  %v3947_v29 = vld [vmem:[%s5144_s3 + $0x58] sm:$0xff]  }
  0xfa   :  { %1511 = vmatmul.mubr.bf16.gmra.mrb[40].mxu0 %v3872_v30 }
  0xfb   :  { %1520 = vmatprep.mubr.bf16.mxu0 %v3876_v31  ;;  %v3948_v31 = vld [vmem:[%s5144_s3 + $0x18] sm:$0xff]  }
 0x102   :  { %1521 = vmatmul.mubr.bf16.gmra.mrb[44].mxu0 %v3878_v33 }
 0x103   :  { %1530 = vmatprep.mubr.bf16.mxu0 %v2915_v34 }
 0x10a   :  { %1531 = vmatmul.mubr.bf16.gmra.mrb[48].mxu0 %v2914_v35 }
 0x10b   :  { %1571 = vmatprep.mubr.bf16.mxu0 %v3889_v36 }
 0x112   :  { %1572 = vmatmul.mubr.bf16.vlgmr.msra.gmra.mrb[0].mxu0 %v3887_v37  ;;  %v3949_v37 = vld [vmem:[%s5144_s3 + $0x60] sm:$0xff]  }
 0x113   :  { %1701 = vmatpush1.bf16.msra.mxu0 %v4293_v24  ;;  %1581 = vmatprep.mubr.bf16.mxu0 %v3893_v39  ;;  %v3901_v24 = vld [vmem:[%s5143_s0 + $0xb8] ss:$28 sps:$4 sm:$0xff]  }
 0x11a   :  { %1582 = vmatmul.mubr.bf16.gmra.mrb[4].mxu0 %v3895_v40  ;;  %v3950_v40 = vld [vmem:[%s5144_s3 + $0x20] sm:$0xff]  }
 0x11b   :  { %1591 = vmatprep.mubr.bf16.mxu0 %v3896_v41 }
 0x11c   :  { %v4612_v1 = vpop.f32.mrb[0].mxu1 }
 0x11d   :  { %v4614_v2 = vpop.f32.mrb[1].mxu1 }
 0x11e   :  { %v4617_v3 = vpop.f32.mrb[2].mxu1 }
 0x11f   :  { %v4620_v4 = vpop.f32.mrb[3].mxu1 }
 0x122   :  { %1592 = vmatmul.mubr.bf16.gmra.mrb[8].mxu0 %v3898_v42 }
 0x123   :  { %1601 = vmatprep.mubr.bf16.mxu0 %v3899_v43 }
 0x124   :  { %v4625_v6 = vpop.f32.mrb[4].mxu1 }
 0x125   :  { %v4627_v7 = vpop.f32.mrb[5].mxu1 }
 0x126   :  { %v4630_v8 = vpop.f32.mrb[6].mxu1 }
 0x127   :  { %v4632_v9 = vpop.f32.mrb[7].mxu1 }
 0x12a   :  { %1602 = vmatmul.mubr.bf16.gmra.mrb[12].mxu0 %v3901_v24 }
 0x12b   :  { %1611 = vmatprep.mubr.bf16.mxu0 %v3903_v44  ;;  %v3951_v44 = vld [vmem:[%s5144_s3 + $0x68] sm:$0xff]  }
 0x12c   :  { %v4640_v11 = vpop.f32.mrb[8].mxu1 }
 0x12d   :  { %v4642_v12 = vpop.f32.mrb[9].mxu1 }
 0x12e   :  { %v4644_v13 = vpop.f32.mrb[10].mxu1 }
 0x12f   :  { %v4646_v14 = vpop.f32.mrb[11].mxu1 }
 0x132   :  { %1612 = vmatmul.mubr.bf16.gmra.mrb[16].mxu0 %v3905_v45  ;;  %v3952_v45 = vld [vmem:[%s5144_s3 + $0x28] sm:$0xff]  }
 0x133   :  { %1621 = vmatprep.mubr.bf16.mxu0 %v3907_v46 }
 0x134   :  { %v4654_v17 = vpop.f32.mrb[12].mxu1 }
 0x135   :  { %v4656_v18 = vpop.f32.mrb[13].mxu1 }
 0x136   :  { %v4658_v19 = vpop.f32.mrb[14].mxu1 }
 0x137   :  { %v4660_v20 = vpop.f32.mrb[15].mxu1 }
 0x13a   :  { %1622 = vmatmul.mubr.bf16.gmra.mrb[20].mxu0 %v3909_v47 }
 0x13b   :  { %1631 = vmatprep.mubr.bf16.mxu0 %v3911_v48 }
 0x13f   :  { %v4668_v23 = vpop.f32.mrb[16].mxu1 }
 0x140   :  { %v4670_v26 = vpop.f32.mrb[17].mxu1 }
 0x141   :  { %v4672_v27 = vpop.f32.mrb[18].mxu1 }
 0x142   :  { %1632 = vmatmul.mubr.bf16.gmra.mrb[24].mxu0 %v3913_v49  ;;  %v4674_v28 = vpop.f32.mrb[19].mxu1 }
 0x143   :  { %1641 = vmatprep.mubr.bf16.mxu0 %v3915_v50  ;;  %v3953_v50 = vld [vmem:[%s5144_s3 + $0x70] sm:$0xff]  }
 0x147   :  { %v4679_v25 = vpop.f32.mrb[20].mxu1 }
 0x148   :  { %v4681_v30 = vpop.f32.mrb[21].mxu1 }
 0x149   :  { %v4686_v32 = vpop.f32.mrb[22].mxu1 }
 0x14a   :  { %1642 = vmatmul.mubr.bf16.gmra.mrb[28].mxu0 %v3917_v51  ;;  %v4688_v33 = vpop.f32.mrb[23].mxu1  ;;  %v3954_v51 = vld [vmem:[%s5144_s3 + $0x30] sm:$0xff]  }
 0x14b   :  { %1651 = vmatprep.mubr.bf16.mxu0 %v3919_v52 }
 0x14f   :  { %v4690_v34 = vpop.f32.mrb[24].mxu1 }
 0x150   :  { %v4692_v35 = vpop.f32.mrb[25].mxu1 }
 0x151   :  { %v4694_v36 = vpop.f32.mrb[26].mxu1 }
 0x152   :  { %1652 = vmatmul.mubr.bf16.gmra.mrb[32].mxu0 %v3921_v53  ;;  %v4699_v39 = vpop.f32.mrb[27].mxu1 }
 0x153   :  { %1661 = vmatprep.mubr.bf16.mxu0 %v3923_v54 }
 0x15a   :  { %1662 = vmatmul.mubr.bf16.gmra.mrb[36].mxu0 %v3925_v55 }
 0x15b   :  { %1671 = vmatprep.mubr.bf16.mxu0 %v3927_v56  ;;  %v3955_v56 = vld [vmem:[%s5144_s3 + $0x78] sm:$0xff]  }
 0x15f   :  { %v4704_v41 = vpop.f32.mrb[28].mxu1 }
 0x160   :  { %v4706_v42 = vpop.f32.mrb[29].mxu1 }
 0x161   :  { %v4708_v43 = vpop.f32.mrb[30].mxu1 }
 0x162   :  { %1672 = vmatmul.mubr.bf16.gmra.mrb[40].mxu0 %v3929_v57  ;;  %v4710_v24 = vpop.f32.mrb[31].mxu1  ;;  %v3956_v57 = vld [vmem:[%s5144_s3 + $0x38] sm:$0xff]  }
 0x163   :  { %1681 = vmatprep.mubr.bf16.mxu0 %v3931_v58  ;;  %v233_v58 = vlaneseq }
 0x165   :  { %v234_v59 = vshrl.u32 %v233_v58, 7 }
 0x16a   :  { %1682 = vmatmul.mubr.bf16.gmra.mrb[44].mxu0 %v3933_v60  ;;  %v235_v60 = vsub.s32 0, %v234_v59 }
 0x16b   :  { %1691 = vmatprep.mubr.bf16.mxu0 %v2917_v61  ;;  %v231_v61 = vld [vmem:[%s5145_s2] sm:$0x3] }
 0x16e   :  { %v4718_v46 = vpop.f32.mrb[32].mxu1 }
 0x16f   :  { %v4720_v47 = vpop.f32.mrb[33].mxu1 }
 0x170   :  { %v4722_v48 = vpop.f32.mrb[34].mxu1 }
 0x171   :  { %v4724_v49 = vpop.f32.mrb[35].mxu1 }
 0x172   :  { %1692 = vmatmul.mubr.bf16.gmra.mrb[48].mxu0 %v2916_v62  ;;  %v239_v62 = vsub.s32 1, %v234_v59 }
 0x173   :  { %1732 = vmatprep.mubr.bf16.mxu0 %v3973_v38 }
 0x17a   :  { %3017 = vmatmul.mubr.msk.bf16.vlgmr.msra.gmra.mrb[0].mxu0 %vm1177_vm0, %v3938_v63  ;;  %v4745_v63 = vrot.slane %v231_v61, %v235_v60 }
 0x17b   :  { %1742 = vmatprep.mubr.bf16.mxu0 %v3973_v38 }
 0x182   :  { %3018 = vmatmul.mubr.msk.bf16.gmra.mrb[4].mxu0 %vm1177_vm0, %v3939_v0  ;;  %v4747_v0 = vrot.slane %v231_v61, %v239_v62 }
 0x183   :  { %1752 = vmatprep.mubr.bf16.mxu0 %v3973_v38  ;;  %v3941_v38 = vld [vmem:[%s5144_s3 + $0x40] sm:$0xff]  }
 0x184   :  { %3186 = vmatprep.subr.bf16.mxu1 %v3941_v38 }
 0x185   :  { %3187 = vmatpush3.bf16.msra.mxu1 %v3942_v10 }
 0x186   :  { %3188 = vmatprep.subr.bf16.mxu1 %v3943_v15 }
 0x189   :  { %3189 = vmatpush3.bf16.msra.mxu1 %v3944_v16 }
 0x18a   :  { %3019 = vmatmul.mubr.msk.bf16.gmra.mrb[8].mxu0 %vm1177_vm0, %v3940_v5  ;;  %3190 = vmatprep.subr.bf16.mxu1 %v3945_v21 }
 0x18d   :  { %3191 = vmatpush3.bf16.msra.mxu1 %v3946_v22 }
 0x18e   :  { %3192 = vmatprep.subr.bf16.mxu1 %v3947_v29 }
 0x191   :  { %3193 = vmatpush3.bf16.msra.mxu1 %v3948_v31 }
 0x192   :  { %3194 = vmatprep.subr.bf16.mxu1 %v3949_v37 }
 0x195   :  { %3195 = vmatpush3.bf16.msra.mxu1 %v3950_v40 }
 0x196   :  { %3196 = vmatprep.subr.bf16.mxu1 %v3951_v44 }
 0x199   :  { %3197 = vmatpush3.bf16.msra.mxu1 %v3952_v45 }
 0x19a   :  { %3198 = vmatprep.subr.bf16.mxu1 %v3953_v50 }
 0x19d   :  { %3199 = vmatpush3.bf16.msra.mxu1 %v3954_v51 }
 0x19e   :  { %3200 = vmatprep.subr.bf16.mxu1 %v3955_v56 }
 0x1a1   :  { %3201 = vmatpush3.bf16.msra.mxu1 %v3956_v57 }
 0x1bc   :  { %v4732_v52 = vpop.f32.mrb[36].mxu1 }
 0x1bd   :  { %v4734_v53 = vpop.f32.mrb[37].mxu1 }
 0x1be   :  { %v1858_v54 = vpop.f32.mrb[38].mxu1 }
 0x1bf   :  { %v1859_v55 = vpop.f32.mrb[39].mxu1 }
 0x1fd   :  { %v1603_v5 = vpop.f32.mrb[12].mxu0 }
 0x1fe   :  { %v3472_v38 = vadd.f32 %v1603_v5, %v4745_v63  ;;  %v1605_v10 = vpop.f32.mrb[13].mxu0 }
 0x1ff   :  { %v3474_v15 = vadd.f32 %v1605_v10, %v4747_v0  ;;  %v1607_v16 = vpop.f32.mrb[14].mxu0 }
 0x200   :  { %v3476_v21 = vadd.f32 %v1607_v16, %v4745_v63  ;;  %v3473_v22 = vadd.f32 %v3472_v38, %v4612_v1  ;;  %v1609_v29 = vpop.f32.mrb[15].mxu0 }
 0x201   :  { %v3478_v31 = vadd.f32 %v1609_v29, %v4747_v0  ;;  %v3475_v37 = vadd.f32 %v3474_v15, %v4614_v2 }
 0x202   :  { %v3477_v40 = vadd.f32 %v3476_v21, %v4617_v3  ;;  %v1873_v45 = vmax.f32 %v3473_v22, 0.0 }
 0x203   :  { %v3479_v44 = vadd.f32 %v3478_v31, %v4620_v4  ;;  %v1874_v51 = vmax.f32 %v3475_v37, 0.0 }
 0x204   :  { %v1875_v50 = vmax.f32 %v3477_v40, 0.0 }
 0x205   :  { %v1876_v54 = vmax.f32 %v3479_v44, 0.0  ;;  %v1613_v55 = vpop.f32.mrb[16].mxu0 }
 0x206   :  { %v4757_v56 = vpack.c.bf16 %v1875_v50, %v1873_v45  ;;  %v3480_v57 = vadd.f32 %v1613_v55, %v4745_v63  ;;  %v1615_v58 = vpop.f32.mrb[17].mxu0 }
 0x207   :  { %v4760_v1 = vpack.c.bf16 %v1876_v54, %v1874_v51  ;;  %v3482_v59 = vadd.f32 %v1615_v58, %v4747_v0  ;;  %v1617_v60 = vpop.f32.mrb[18].mxu0 }
 0x208   :  { %v3484_v2 = vadd.f32 %v1617_v60, %v4745_v63  ;;  %v3481_v3 = vadd.f32 %v3480_v57, %v4625_v6  ;;  %v1619_v4 = vpop.f32.mrb[19].mxu0 }
 0x209   :  { %v3486_v61 = vadd.f32 %v1619_v4, %v4747_v0  ;;  %v3483_v62 = vadd.f32 %v3482_v59, %v4627_v7 }
 0x20a   :  { %v3485_v5 = vadd.f32 %v3484_v2, %v4630_v8  ;;  %v1877_v10 = vmax.f32 %v3481_v3, 0.0 }
 0x20b   :  { %v3487_v38 = vadd.f32 %v3486_v61, %v4632_v9  ;;  %v1878_v16 = vmax.f32 %v3483_v62, 0.0 }
 0x20c   :  { %v1879_v15 = vmax.f32 %v3485_v5, 0.0 }
 0x20d   :  { %v1880_v21 = vmax.f32 %v3487_v38, 0.0  ;;  %v1623_v22 = vpop.f32.mrb[20].mxu0 }
 0x20e   :  { %v4769_v29 = vpack.c.bf16 %v1879_v15, %v1877_v10  ;;  %v3488_v31 = vadd.f32 %v1623_v22, %v4745_v63  ;;  %v1625_v37 = vpop.f32.mrb[21].mxu0 }
 0x20f   :  { %v4772_v6 = vpack.c.bf16 %v1880_v21, %v1878_v16  ;;  %v3490_v40 = vadd.f32 %v1625_v37, %v4747_v0  ;;  %v1627_v44 = vpop.f32.mrb[22].mxu0 }
 0x210   :  { %v3492_v7 = vadd.f32 %v1627_v44, %v4745_v63  ;;  %v3489_v8 = vadd.f32 %v3488_v31, %v4640_v11  ;;  %v1629_v9 = vpop.f32.mrb[23].mxu0 }
 0x211   :  { %v3494_v45 = vadd.f32 %v1629_v9, %v4747_v0  ;;  %v3491_v50 = vadd.f32 %v3490_v40, %v4642_v12 }
 0x212   :  { %v3493_v51 = vadd.f32 %v3492_v7, %v4644_v13  ;;  %v1881_v55 = vmax.f32 %v3489_v8, 0.0 }
 0x213   :  { %v3495_v54 = vadd.f32 %v3494_v45, %v4646_v14  ;;  %v1882_v58 = vmax.f32 %v3491_v50, 0.0 }
 0x214   :  { %v1883_v57 = vmax.f32 %v3493_v51, 0.0 }
 0x215   :  { %v1884_v59 = vmax.f32 %v3495_v54, 0.0  ;;  %v1633_v60 = vpop.f32.mrb[24].mxu0 }
 0x216   :  { %v4781_v2 = vpack.c.bf16 %v1883_v57, %v1881_v55  ;;  %v3496_v3 = vadd.f32 %v1633_v60, %v4745_v63  ;;  %v1635_v4 = vpop.f32.mrb[25].mxu0 }
 0x217   :  { %v4784_v11 = vpack.c.bf16 %v1884_v59, %v1882_v58  ;;  %v3498_v61 = vadd.f32 %v1635_v4, %v4747_v0  ;;  %v1637_v62 = vpop.f32.mrb[26].mxu0 }
 0x218   :  { %v3500_v12 = vadd.f32 %v1637_v62, %v4745_v63  ;;  %v3497_v13 = vadd.f32 %v3496_v3, %v4654_v17  ;;  %v1639_v14 = vpop.f32.mrb[27].mxu0 }
 0x219   :  { %v3502_v5 = vadd.f32 %v1639_v14, %v4747_v0  ;;  %v3499_v38 = vadd.f32 %v3498_v61, %v4656_v18 }
 0x21a   :  { %v3501_v10 = vadd.f32 %v3500_v12, %v4658_v19  ;;  %v1885_v16 = vmax.f32 %v3497_v13, 0.0 }
 0x21b   :  { %v3503_v15 = vadd.f32 %v3502_v5, %v4660_v20  ;;  %v1886_v22 = vmax.f32 %v3499_v38, 0.0 }
 0x21c   :  { %v1887_v21 = vmax.f32 %v3501_v10, 0.0 }
 0x21d   :  { %v1888_v31 = vmax.f32 %v3503_v15, 0.0  ;;  %v1643_v37 = vpop.f32.mrb[28].mxu0 }
 0x21e   :  { %v4793_v40 = vpack.c.bf16 %v1887_v21, %v1885_v16  ;;  %v3504_v44 = vadd.f32 %v1643_v37, %v4745_v63  ;;  %v1645_v7 = vpop.f32.mrb[29].mxu0 }
 0x21f   :  { %v4796_v17 = vpack.c.bf16 %v1888_v31, %v1886_v22  ;;  %v3506_v8 = vadd.f32 %v1645_v7, %v4747_v0  ;;  %v1647_v9 = vpop.f32.mrb[30].mxu0 }
 0x220   :  { %v3508_v18 = vadd.f32 %v1647_v9, %v4745_v63  ;;  %v3505_v19 = vadd.f32 %v3504_v44, %v4668_v23  ;;  %v1649_v20 = vpop.f32.mrb[31].mxu0 }
 0x221   :  { %v3510_v45 = vadd.f32 %v1649_v20, %v4747_v0  ;;  %v3507_v50 = vadd.f32 %v3506_v8, %v4670_v26 }
 0x222   :  { %v3509_v51 = vadd.f32 %v3508_v18, %v4672_v27  ;;  %v1889_v55 = vmax.f32 %v3505_v19, 0.0 }
 0x223   :  { %v3511_v54 = vadd.f32 %v3510_v45, %v4674_v28  ;;  %v1890_v58 = vmax.f32 %v3507_v50, 0.0 }
 0x224   :  { %v1891_v57 = vmax.f32 %v3509_v51, 0.0 }
 0x225   :  { %v1892_v59 = vmax.f32 %v3511_v54, 0.0  ;;  %v1653_v60 = vpop.f32.mrb[32].mxu0 }
 0x226   :  { %v4805_v3 = vpack.c.bf16 %v1891_v57, %v1889_v55  ;;  %v3512_v4 = vadd.f32 %v1653_v60, %v4745_v63  ;;  %v1655_v61 = vpop.f32.mrb[33].mxu0 }
 0x227   :  { %v4808_v23 = vpack.c.bf16 %v1892_v59, %v1890_v58  ;;  %v3514_v62 = vadd.f32 %v1655_v61, %v4747_v0  ;;  %v1657_v12 = vpop.f32.mrb[34].mxu0 }
 0x228   :  { %v3516_v26 = vadd.f32 %v1657_v12, %v4745_v63  ;;  %v3513_v27 = vadd.f32 %v3512_v4, %v4679_v25  ;;  %v1659_v28 = vpop.f32.mrb[35].mxu0  ;;  %v3974_v12 = vmov 0.0  }
 0x229   :  { %v3518_v13 = vadd.f32 %v1659_v28, %v4747_v0  ;;  %v3515_v14 = vadd.f32 %v3514_v62, %v4681_v30  ;;  %3322 = vmatprep.subr.bf16.mxu1 %v3974_v12 }
 0x22a   :  { %v3517_v5 = vadd.f32 %v3516_v26, %v4686_v32  ;;  %v1893_v10 = vmax.f32 %v3513_v27, 0.0 }
 0x22b   :  { %v3519_v38 = vadd.f32 %v3518_v13, %v4688_v33  ;;  %v1894_v16 = vmax.f32 %v3515_v14, 0.0 }
 0x22c   :  { %v1895_v15 = vmax.f32 %v3517_v5, 0.0 }
 0x22d   :  { %v1896_v21 = vmax.f32 %v3519_v38, 0.0  ;;  %v1663_v22 = vpop.f32.mrb[36].mxu0 }
 0x22e   :  { %v4817_v31 = vpack.c.bf16 %v1895_v15, %v1893_v10  ;;  %v3520_v37 = vadd.f32 %v1663_v22, %v4745_v63  ;;  %v1665_v44 = vpop.f32.mrb[37].mxu0 }
 0x22f   :  { %v4820_v25 = vpack.c.bf16 %v1896_v21, %v1894_v16  ;;  %v3522_v7 = vadd.f32 %v1665_v44, %v4747_v0  ;;  %v1667_v8 = vpop.f32.mrb[38].mxu0 }
 0x230   :  { %v3524_v30 = vadd.f32 %v1667_v8, %v4745_v63  ;;  %v3521_v32 = vadd.f32 %v3520_v37, %v4690_v34  ;;  %v1669_v33 = vpop.f32.mrb[39].mxu0 }
 0x231   :  { %v3526_v9 = vadd.f32 %v1669_v33, %v4747_v0  ;;  %v3523_v18 = vadd.f32 %v3522_v7, %v4692_v35 }
 0x232   :  { %v3525_v19 = vadd.f32 %v3524_v30, %v4694_v36  ;;  %v1897_v45 = vmax.f32 %v3521_v32, 0.0 }
 0x233   :  { %v3527_v20 = vadd.f32 %v3526_v9, %v4699_v39  ;;  %v1898_v51 = vmax.f32 %v3523_v18, 0.0 }
 0x234   :  { %v1899_v50 = vmax.f32 %v3525_v19, 0.0 }
 0x235   :  { %v1900_v54 = vmax.f32 %v3527_v20, 0.0  ;;  %v1673_v55 = vpop.f32.mrb[40].mxu0 }
 0x236   :  { %v4829_v57 = vpack.c.bf16 %v1899_v50, %v1897_v45  ;;  %v3528_v58 = vadd.f32 %v1673_v55, %v4745_v63  ;;  %v1675_v59 = vpop.f32.mrb[41].mxu0 }
 0x237   :  { %v4832_v34 = vpack.c.bf16 %v1900_v54, %v1898_v51  ;;  %v3530_v60 = vadd.f32 %v1675_v59, %v4747_v0  ;;  %v1677_v4 = vpop.f32.mrb[42].mxu0 }
 0x238   :  { %v3532_v35 = vadd.f32 %v1677_v4, %v4745_v63  ;;  %v3529_v36 = vadd.f32 %v3528_v58, %v4704_v41  ;;  %v1679_v39 = vpop.f32.mrb[43].mxu0 }
 0x239   :  { %v3534_v61 = vadd.f32 %v1679_v39, %v4747_v0  ;;  %v3531_v62 = vadd.f32 %v3530_v60, %v4706_v42 }
 0x23a   :  { %v3533_v26 = vadd.f32 %v3532_v35, %v4708_v43  ;;  %v1901_v27 = vmax.f32 %v3529_v36, 0.0 }
 0x23b   :  { %v3535_v28 = vadd.f32 %v3534_v61, %v4710_v24  ;;  %v1902_v13 = vmax.f32 %v3531_v62, 0.0 }
 0x23c   :  { %v1903_v14 = vmax.f32 %v3533_v26, 0.0 }
 0x23d   :  { %v1904_v5 = vmax.f32 %v3535_v28, 0.0  ;;  %v1683_v38 = vpop.f32.mrb[44].mxu0  ;;  %v3957_v28 = vld [vmem:[%s5146_s5] sm:$0xff]  }
 0x23e   :  { %v4842_v10 = vpack.c.bf16 %v1903_v14, %v1901_v27  ;;  %v3536_v41 = vadd.f32 %v1683_v38, %v4745_v63  ;;  %v1685_v15 = vpop.f32.mrb[45].mxu0 }
 0x23f   :  { %v4845_v16 = vpack.c.bf16 %v1904_v5, %v1902_v13  ;;  %v3538_v42 = vadd.f32 %v1685_v15, %v4747_v0  ;;  %v1687_v21 = vpop.f32.mrb[46].mxu0 }
 0x240   :  { %v3540_v22 = vadd.f32 %v1687_v21, %v4745_v63  ;;  %v3537_v43 = vadd.f32 %v3536_v41, %v4718_v46  ;;  %v1689_v37 = vpop.f32.mrb[47].mxu0  ;;  %v3958_v21 = vld [vmem:[%s5146_s5 + $0x8] sm:$0xff]  }
 0x241   :  { %v3542_v24 = vadd.f32 %v1689_v37, %v4747_v0  ;;  %v3539_v44 = vadd.f32 %v3538_v42, %v4720_v47 }
 0x242   :  { %v3541_v7 = vadd.f32 %v3540_v22, %v4722_v48  ;;  %v1905_v30 = vmax.f32 %v3537_v43, 0.0 }
 0x243   :  { %v3543_v8 = vadd.f32 %v3542_v24, %v4724_v49  ;;  %v1906_v33 = vmax.f32 %v3539_v44, 0.0 }
 0x244   :  { %v1907_v32 = vmax.f32 %v3541_v7, 0.0 }
 0x245   :  { %v1908_v9 = vmax.f32 %v3543_v8, 0.0  ;;  %v1693_v18 = vpop.f32.mrb[48].mxu0 }
 0x246   :  { %v4854_v19 = vpack.c.bf16 %v1907_v32, %v1905_v30  ;;  %v3544_v20 = vadd.f32 %v1693_v18, %v4745_v63  ;;  %v1695_v45 = vpop.f32.mrb[49].mxu0  ;;  %v3959_v30 = vld [vmem:[%s5146_s5 + $0x10] sm:$0xff]  }
 0x247   :  { %v4857_v46 = vpack.c.bf16 %v1908_v9, %v1906_v33  ;;  %v3546_v50 = vadd.f32 %v1695_v45, %v4747_v0  ;;  %v1697_v51 = vpop.f32.mrb[50].mxu0 }
 0x248   :  { %v4861_v47 = vadd.f32 %v3544_v20, %v4732_v52  ;;  %v1698_v48 = vpop.f32.mrb[51].mxu0  ;;  %v3960_v51 = vld [vmem:[%s5146_s5 + $0x18] sm:$0xff]  }
 0x249   :  { %v4864_v49 = vadd.f32 %v3546_v50, %v4734_v53 }
 0x24d   :  { %v1734_v54 = vpop.f32.mrb[0].mxu0 }
 0x24e   :  { %v3460_v55 = vadd.f32 %v1734_v54, %v4745_v63  ;;  %v1736_v58 = vpop.f32.mrb[1].mxu0 }
 0x24f   :  { %v3461_v59 = vadd.f32 %v1736_v58, %v4747_v0  ;;  %v1738_v60 = vpop.f32.mrb[2].mxu0 }
 0x250   :  { %v3462_v4 = vadd.f32 %v1738_v60, %v4745_v63  ;;  %v1740_v35 = vpop.f32.mrb[3].mxu0  ;;  %v1861_v39 = vmax.f32 %v3460_v55, 0.0 }
 0x251   :  { %v3463_v36 = vadd.f32 %v1740_v35, %v4747_v0  ;;  %v1862_v52 = vmax.f32 %v3461_v59, 0.0 }
 0x252   :  { %v1863_v61 = vmax.f32 %v3462_v4, 0.0  ;;  %v3963_v4 = vld [vmem:[%s5146_s5 + $0x30] sm:$0xff]  }
 0x253   :  { %v1864_v62 = vmax.f32 %v3463_v36, 0.0 }
 0x254   :  { %v1911_v26 = vpack.c.bf16 %v1863_v61, %v1861_v39 }
 0x255   :  { %v1912_v27 = vpack.c.bf16 %v1864_v62, %v1862_v52  ;;  %v1744_v53 = vpop.f32.mrb[4].mxu0  ;;  %v3966_v62 = vld [vmem:[%s5147_s7 + $0x8] sm:$0xff]  }
 0x256   :  { %v3464_v13 = vadd.f32 %v1744_v53, %v4745_v63  ;;  %v1746_v14 = vpop.f32.mrb[5].mxu0 }
 0x257   :  { %v3465_v5 = vadd.f32 %v1746_v14, %v4747_v0  ;;  %v1748_v38 = vpop.f32.mrb[6].mxu0  ;;  %2104 = vmatprep.mubr.bf16.mxu1 %v1912_v27  ;;  %v3967_v14 = vld [vmem:[%s5147_s7 + $0x10] sm:$0xff]  }
 0x258   :  { %v3466_v41 = vadd.f32 %v1748_v38, %v4745_v63  ;;  %v1750_v15 = vpop.f32.mrb[7].mxu0  ;;  %2105 = vmatmul.mubr.bf16.vlgmr.msra.gmra.mrb[40].mxu1 %v1911_v26  ;;  %v1865_v22 = vmax.f32 %v3464_v13, 0.0 }
 0x259   :  { %v3467_v42 = vadd.f32 %v1750_v15, %v4747_v0  ;;  %3323 = vmatpush3.bf16.msra.mxu1 %v3957_v28  ;;  %v1866_v37 = vmax.f32 %v3465_v5, 0.0 }
 0x25a   :  { %v1867_v43 = vmax.f32 %v3466_v41, 0.0  ;;  %3324 = vmatprep.subr.bf16.mxu1 %v3974_v12 }
 0x25b   :  { %v1868_v24 = vmax.f32 %v3467_v42, 0.0 }
 0x25c   :  { %v1913_v44 = vpack.c.bf16 %v1867_v43, %v1865_v22  ;;  %v3968_v22 = vld [vmem:[%s5147_s7 + $0x18] sm:$0xff]  }
 0x25d   :  { %v1914_v7 = vpack.c.bf16 %v1868_v24, %v1866_v37  ;;  %v1754_v8 = vpop.f32.mrb[8].mxu0  ;;  %3325 = vmatpush3.bf16.msra.mxu1 %v3958_v21 }
 0x25e   :  { %v3468_v32 = vadd.f32 %v1754_v8, %v4745_v63  ;;  %v1756_v33 = vpop.f32.mrb[9].mxu0  ;;  %3326 = vmatprep.subr.bf16.mxu1 %v3974_v12  ;;  %v3969_v8 = vld [vmem:[%s5147_s7 + $0x20] sm:$0xff]  }
 0x25f   :  { %v3469_v9 = vadd.f32 %v1756_v33, %v4747_v0  ;;  %v1758_v18 = vpop.f32.mrb[10].mxu0  ;;  %2112 = vmatprep.mubr.bf16.mxu1 %v1914_v7 }
 0x260   :  { %v3470_v20 = vadd.f32 %v1758_v18, %v4745_v63  ;;  %v1760_v45 = vpop.f32.mrb[11].mxu0  ;;  %2113 = vmatmul.mubr.bf16.gmra.mrb[44].mxu1 %v1913_v44  ;;  %v1869_v48 = vmax.f32 %v3468_v32, 0.0  ;;  %v3961_v63 = vld [vmem:[%s5146_s5 + $0x20] sm:$0xff]  }
 0x261   :  { %v3471_v50 = vadd.f32 %v1760_v45, %v4747_v0  ;;  %3327 = vmatpush3.bf16.msra.mxu1 %v3959_v30  ;;  %v1870_v55 = vmax.f32 %v3469_v9, 0.0  ;;  %v3962_v0 = vld [vmem:[%s5146_s5 + $0x28] sm:$0xff]  }
 0x262   :  { %v1871_v54 = vmax.f32 %v3470_v20, 0.0  ;;  %3328 = vmatprep.subr.bf16.mxu1 %v3974_v12  ;;  %v3970_v45 = vld [vmem:[%s5147_s7 + $0x28] sm:$0xff]  }
 0x263   :  { %v1872_v58 = vmax.f32 %v3471_v50, 0.0 }
 0x264   :  { %v1915_v59 = vpack.c.bf16 %v1871_v54, %v1869_v48 }
 0x265   :  { %v1916_v60 = vpack.c.bf16 %v1872_v58, %v1870_v55  ;;  %3329 = vmatpush3.bf16.msra.mxu1 %v3960_v51  ;;  %v3971_v58 = vld [vmem:[%s5147_s7 + $0x30] sm:$0xff]  }
 0x266   :  { %3330 = vmatprep.subr.bf16.mxu1 %v3974_v12 }
 0x267   :  { %2120 = vmatprep.mubr.bf16.mxu1 %v1916_v60 }
 0x268   :  { %2121 = vmatmul.mubr.bf16.gmra.mrb[48].mxu1 %v1915_v59 }
 0x269   :  { %2128 = vmatprep.mubr.bf16.mxu1 %v4760_v1  ;;  %3331 = vmatpush3.bf16.msra.mxu1 %v3961_v63  ;;  %v3964_v1 = vld [vmem:[%s5146_s5 + $0x38] sm:$0xff]  }
 0x26a   :  { %3332 = vmatprep.subr.bf16.mxu1 %v3974_v12 }
 0x26d   :  { %3333 = vmatpush3.bf16.msra.mxu1 %v3962_v0 }
 0x26e   :  { %3334 = vmatprep.subr.bf16.mxu1 %v3974_v12 }
 0x270   :  { %2129 = vmatmul.mubr.bf16.gmra.mrb[52].mxu1 %v4757_v56  ;;  %v1910_v56 = vmax.f32 %v4864_v49, 0.0 }
 0x271   :  { %2136 = vmatprep.mubr.bf16.mxu1 %v4772_v6  ;;  %3335 = vmatpush3.bf16.msra.mxu1 %v3963_v4  ;;  %v1909_v6 = vmax.f32 %v4861_v47, 0.0  ;;  %v3965_v47 = vld [vmem:[%s5147_s7] sm:$0xff]  }
 0x272   :  { %3336 = vmatprep.subr.bf16.mxu1 %v3974_v12 }
 0x275   :  { %3337 = vmatpush3.bf16.msra.mxu1 %v3964_v1  ;;  %v3972_v1 = vld [vmem:[%s5147_s7 + $0x38] sm:$0xff]  }
 0x276   :  { %3390 = vmatprep.subr.bf16.mxu1 %v3974_v12 }
 0x278   :  { %2137 = vmatmul.mubr.bf16.gmra.mrb[56].mxu1 %v4769_v29  ;;  %v1936_v29 = vpack.c.bf16 %v1910_v56, %v1910_v56 }
 0x279   :  { %2144 = vmatprep.mubr.bf16.mxu1 %v4784_v11 }
 0x280   :  { %2145 = vmatmul.mubr.bf16.gmra.mrb[60].mxu1 %v4781_v2  ;;  %v1935_v2 = vpack.c.bf16 %v1909_v6, %v1909_v6 }
 0x281   :  { %2152 = vmatprep.mubr.bf16.mxu1 %v4796_v17 }
 0x288   :  { %2153 = vmatmul.mubr.bf16.gmra.mrb[64].mxu1 %v4793_v40  ;;  %v4935_v40 = vld [vmem:[%s5148_s4] ss:$0 sm:$0xff] }
 0x289   :  { %2160 = vmatprep.mubr.bf16.mxu1 %v4808_v23 }
 0x290   :  { %2161 = vmatmul.mubr.bf16.gmra.mrb[68].mxu1 %v4805_v3 }
 0x291   :  { %2168 = vmatprep.mubr.bf16.mxu1 %v4820_v25 }
 0x298   :  { %2169 = vmatmul.mubr.bf16.gmra.mrb[72].mxu1 %v4817_v31 }
 0x299   :  { %2176 = vmatprep.mubr.bf16.mxu1 %v4832_v34 }
 0x2a0   :  { %2177 = vmatmul.mubr.bf16.gmra.mrb[76].mxu1 %v4829_v57 }
 0x2a1   :  { %2184 = vmatprep.mubr.bf16.mxu1 %v4845_v16 }
 0x2a8   :  { %2185 = vmatmul.mubr.bf16.gmra.mrb[80].mxu1 %v4842_v10 }
 0x2a9   :  { %2192 = vmatprep.mubr.bf16.mxu1 %v4857_v46 }
 0x2b0   :  { %2193 = vmatmul.mubr.bf16.gmra.mrb[84].mxu1 %v4854_v19 }
 0x2b1   :  { %2200 = vmatprep.mubr.bf16.mxu1 %v1936_v29 }
 0x2b8   :  { %2201 = vmatmul.mubr.bf16.gmra.mrb[88].mxu1 %v1935_v2 }
 0x2b9   :  { %3338 = vmatprep.mubr.msk.bf16.mxu1 %vm3975_vm1, %v3974_v12 }
 0x32b   :  { %v3202_v11 = vpop.f32.mrb[40].mxu1 }
 0x32c   :  { %v3203_v17 = vpop.f32.mrb[41].mxu1 }
 0x32d   :  { %v3204_v3 = vadd.f32 %v3203_v17, %v3202_v11  ;;  %v3205_v23 = vpop.f32.mrb[42].mxu1 }
 0x32e   :  { %v3206_v31 = vpop.f32.mrb[43].mxu1 }
 0x32f   :  { %v2107_v25 = vadd.f32 %v3204_v3, %v4935_v40  ;;  %v3207_v57 = vadd.f32 %v3206_v31, %v3205_v23 }
 0x331   :  { %v2110_v34 = vadd.f32 %v3207_v57, %v4935_v40  ;;  %v2208_v10 = vmax.f32 %v2107_v25, 0.0 }
 0x333   :  { %v2209_v16 = vmax.f32 %v2110_v34, 0.0  ;;  %v3208_v19 = vpop.f32.mrb[44].mxu1 }
 0x334   :  { %v3209_v46 = vpop.f32.mrb[45].mxu1 }
 0x335   :  { %v2233_v49 = vpack.c.bf16 %v2209_v16, %v2208_v10  ;;  %v3210_v35 = vadd.f32 %v3209_v46, %v3208_v19  ;;  %v3211_v36 = vpop.f32.mrb[46].mxu1 }
 0x336   :  { %v3212_v39 = vpop.f32.mrb[47].mxu1 }
 0x337   :  { %v2115_v61 = vadd.f32 %v3210_v35, %v4935_v40  ;;  %v3213_v52 = vadd.f32 %v3212_v39, %v3211_v36  ;;  %3339 = vmatmul.mubr.bf16.vlgmr.msra.gmra.mrb[92].mxu1 %v2233_v49 }
 0x338   :  { %3342 = vmatprep.mubr.msk.bf16.mxu1 %vm3975_vm1, %v3974_v12  ;;  %3391 = vmatpush3.bf16.msra.mxu1 %v3965_v47 }
 0x339   :  { %v2118_v26 = vadd.f32 %v3213_v52, %v4935_v40  ;;  %3392 = vmatprep.subr.bf16.mxu1 %v3974_v12  ;;  %v2210_v27 = vmax.f32 %v2115_v61, 0.0 }
 0x33b   :  { %v2211_v53 = vmax.f32 %v2118_v26, 0.0  ;;  %v3214_v28 = vpop.f32.mrb[48].mxu1 }
 0x33c   :  { %v3215_v13 = vpop.f32.mrb[49].mxu1  ;;  %3393 = vmatpush3.bf16.msra.mxu1 %v3966_v62 }
 0x33d   :  { %v3216_v5 = vadd.f32 %v3215_v13, %v3214_v28  ;;  %v3217_v38 = vpop.f32.mrb[50].mxu1  ;;  %v2234_v41 = vpack.c.bf16 %v2211_v53, %v2210_v27  ;;  %3394 = vmatprep.subr.bf16.mxu1 %v3974_v12 }
 0x33e   :  { %v3218_v15 = vpop.f32.mrb[51].mxu1 }
 0x33f   :  { %v2123_v42 = vadd.f32 %v3216_v5, %v4935_v40  ;;  %v3219_v21 = vadd.f32 %v3218_v15, %v3217_v38  ;;  %3343 = vmatmul.mubr.bf16.gmra.mrb[96].mxu1 %v2234_v41 }
 0x340   :  { %3346 = vmatprep.mubr.msk.bf16.mxu1 %vm3975_vm1, %v3974_v12  ;;  %3395 = vmatpush3.bf16.msra.mxu1 %v3967_v14 }
 0x341   :  { %v2126_v43 = vadd.f32 %v3219_v21, %v4935_v40  ;;  %3396 = vmatprep.subr.bf16.mxu1 %v3974_v12  ;;  %v2212_v37 = vmax.f32 %v2123_v42, 0.0 }
 0x343   :  { %v2213_v24 = vmax.f32 %v2126_v43, 0.0  ;;  %v3220_v44 = vpop.f32.mrb[52].mxu1 }
 0x344   :  { %v3221_v7 = vpop.f32.mrb[53].mxu1  ;;  %3397 = vmatpush3.bf16.msra.mxu1 %v3968_v22 }
 0x345   :  { %v3222_v30 = vadd.f32 %v3221_v7, %v3220_v44  ;;  %v3223_v32 = vpop.f32.mrb[54].mxu1  ;;  %v2235_v33 = vpack.c.bf16 %v2213_v24, %v2212_v37  ;;  %3398 = vmatprep.subr.bf16.mxu1 %v3974_v12 }
 0x346   :  { %v3224_v9 = vpop.f32.mrb[55].mxu1 }
 0x347   :  { %v2131_v18 = vadd.f32 %v3222_v30, %v4935_v40  ;;  %v3225_v20 = vadd.f32 %v3224_v9, %v3223_v32  ;;  %3347 = vmatmul.mubr.bf16.gmra.mrb[100].mxu1 %v2235_v33 }
 0x348   :  { %3350 = vmatprep.mubr.msk.bf16.mxu1 %vm3975_vm1, %v3974_v12  ;;  %3399 = vmatpush3.bf16.msra.mxu1 %v3969_v8 }
 0x349   :  { %v2134_v50 = vadd.f32 %v3225_v20, %v4935_v40  ;;  %3400 = vmatprep.subr.bf16.mxu1 %v3974_v12  ;;  %v2214_v51 = vmax.f32 %v2131_v18, 0.0 }
 0x34b   :  { %v2215_v48 = vmax.f32 %v2134_v50, 0.0  ;;  %v3226_v54 = vpop.f32.mrb[56].mxu1 }
 0x34c   :  { %v3227_v55 = vpop.f32.mrb[57].mxu1  ;;  %3401 = vmatpush3.bf16.msra.mxu1 %v3970_v45 }
 0x34d   :  { %v3228_v59 = vadd.f32 %v3227_v55, %v3226_v54  ;;  %v3229_v60 = vpop.f32.mrb[58].mxu1  ;;  %v2236_v63 = vpack.c.bf16 %v2215_v48, %v2214_v51  ;;  %3402 = vmatprep.subr.bf16.mxu1 %v3974_v12 }
 0x34e   :  { %v3230_v0 = vpop.f32.mrb[59].mxu1 }
 0x34f   :  { %v2139_v4 = vadd.f32 %v3228_v59, %v4935_v40  ;;  %v3231_v56 = vadd.f32 %v3230_v0, %v3229_v60  ;;  %3351 = vmatmul.mubr.bf16.gmra.mrb[104].mxu1 %v2236_v63 }
 0x350   :  { %3354 = vmatprep.mubr.msk.bf16.mxu1 %vm3975_vm1, %v3974_v12  ;;  %3403 = vmatpush3.bf16.msra.mxu1 %v3971_v58 }
 0x351   :  { %v2142_v29 = vadd.f32 %v3231_v56, %v4935_v40  ;;  %3404 = vmatprep.subr.bf16.mxu1 %v3974_v12  ;;  %v2216_v6 = vmax.f32 %v2139_v4, 0.0 }
 0x353   :  { %v2217_v2 = vmax.f32 %v2142_v29, 0.0  ;;  %v3232_v11 = vpop.f32.mrb[60].mxu1 }
 0x354   :  { %v3233_v17 = vpop.f32.mrb[61].mxu1  ;;  %3405 = vmatpush3.bf16.msra.mxu1 %v3972_v1 }
 0x355   :  { %v3234_v3 = vadd.f32 %v3233_v17, %v3232_v11  ;;  %v3235_v23 = vpop.f32.mrb[62].mxu1  ;;  %v2237_v31 = vpack.c.bf16 %v2217_v2, %v2216_v6 }
 0x356   :  { %v3236_v25 = vpop.f32.mrb[63].mxu1 }
 0x357   :  { %v2147_v57 = vadd.f32 %v3234_v3, %v4935_v40  ;;  %v3237_v34 = vadd.f32 %v3236_v25, %v3235_v23  ;;  %3355 = vmatmul.mubr.bf16.gmra.mrb[108].mxu1 %v2237_v31 }
 0x358   :  { %3358 = vmatprep.mubr.msk.bf16.mxu1 %vm3975_vm1, %v3974_v12 }
 0x359   :  { %v2150_v10 = vadd.f32 %v3237_v34, %v4935_v40  ;;  %v2218_v16 = vmax.f32 %v2147_v57, 0.0 }
 0x35b   :  { %v2219_v19 = vmax.f32 %v2150_v10, 0.0  ;;  %v3238_v46 = vpop.f32.mrb[64].mxu1 }
 0x35c   :  { %v3239_v47 = vpop.f32.mrb[65].mxu1 }
 0x35d   :  { %v3240_v49 = vadd.f32 %v3239_v47, %v3238_v46  ;;  %v3241_v35 = vpop.f32.mrb[66].mxu1  ;;  %v2238_v36 = vpack.c.bf16 %v2219_v19, %v2218_v16 }
 0x35e   :  { %v3242_v39 = vpop.f32.mrb[67].mxu1 }
 0x35f   :  { %v2155_v61 = vadd.f32 %v3240_v49, %v4935_v40  ;;  %v3243_v52 = vadd.f32 %v3242_v39, %v3241_v35  ;;  %3359 = vmatmul.mubr.bf16.gmra.mrb[112].mxu1 %v2238_v36 }
 0x360   :  { %3362 = vmatprep.mubr.msk.bf16.mxu1 %vm3975_vm1, %v3974_v12 }
 0x361   :  { %v2158_v62 = vadd.f32 %v3243_v52, %v4935_v40  ;;  %v2220_v26 = vmax.f32 %v2155_v61, 0.0 }
 0x363   :  { %v2221_v27 = vmax.f32 %v2158_v62, 0.0  ;;  %v3244_v53 = vpop.f32.mrb[68].mxu1 }
 0x364   :  { %v3245_v28 = vpop.f32.mrb[69].mxu1 }
 0x365   :  { %v3246_v13 = vadd.f32 %v3245_v28, %v3244_v53  ;;  %v3247_v14 = vpop.f32.mrb[70].mxu1  ;;  %v2239_v5 = vpack.c.bf16 %v2221_v27, %v2220_v26 }
 0x366   :  { %v3248_v38 = vpop.f32.mrb[71].mxu1 }
 0x367   :  { %v2163_v41 = vadd.f32 %v3246_v13, %v4935_v40  ;;  %v3249_v15 = vadd.f32 %v3248_v38, %v3247_v14  ;;  %3363 = vmatmul.mubr.bf16.gmra.mrb[116].mxu1 %v2239_v5  ;;  %v5022_v13 = vld [vmem:[%s5149_s6] ss:$0 sm:$0xff] }
 0x368   :  { %3366 = vmatprep.mubr.msk.bf16.mxu1 %vm3975_vm1, %v3974_v12 }
 0x369   :  { %v2166_v42 = vadd.f32 %v3249_v15, %v4935_v40  ;;  %v2222_v21 = vmax.f32 %v2163_v41, 0.0 }
 0x36b   :  { %v2223_v22 = vmax.f32 %v2166_v42, 0.0  ;;  %v3250_v43 = vpop.f32.mrb[72].mxu1 }
 0x36c   :  { %v3251_v37 = vpop.f32.mrb[73].mxu1 }
 0x36d   :  { %v3252_v24 = vadd.f32 %v3251_v37, %v3250_v43  ;;  %v3253_v44 = vpop.f32.mrb[74].mxu1  ;;  %v2240_v7 = vpack.c.bf16 %v2223_v22, %v2222_v21 }
 0x36e   :  { %v3254_v8 = vpop.f32.mrb[75].mxu1 }
 0x36f   :  { %v2171_v30 = vadd.f32 %v3252_v24, %v4935_v40  ;;  %v3255_v32 = vadd.f32 %v3254_v8, %v3253_v44  ;;  %3367 = vmatmul.mubr.bf16.gmra.mrb[120].mxu1 %v2240_v7 }
 0x370   :  { %3370 = vmatprep.mubr.msk.bf16.mxu1 %vm3975_vm1, %v3974_v12 }
 0x371   :  { %v2174_v33 = vadd.f32 %v3255_v32, %v4935_v40  ;;  %v2224_v9 = vmax.f32 %v2171_v30, 0.0 }
 0x373   :  { %v2225_v18 = vmax.f32 %v2174_v33, 0.0  ;;  %v3256_v20 = vpop.f32.mrb[76].mxu1 }
 0x374   :  { %v3257_v45 = vpop.f32.mrb[77].mxu1 }
 0x375   :  { %v3258_v50 = vadd.f32 %v3257_v45, %v3256_v20  ;;  %v3259_v51 = vpop.f32.mrb[78].mxu1  ;;  %v2241_v48 = vpack.c.bf16 %v2225_v18, %v2224_v9 }
 0x376   :  { %v3260_v54 = vpop.f32.mrb[79].mxu1 }
 0x377   :  { %v2179_v55 = vadd.f32 %v3258_v50, %v4935_v40  ;;  %v3261_v58 = vadd.f32 %v3260_v54, %v3259_v51  ;;  %3371 = vmatmul.mubr.bf16.gmra.mrb[124].mxu1 %v2241_v48 }
 0x378   :  { %3374 = vmatprep.mubr.msk.bf16.mxu1 %vm3975_vm1, %v3974_v12 }
 0x379   :  { %v2182_v59 = vadd.f32 %v3261_v58, %v4935_v40  ;;  %v2226_v60 = vmax.f32 %v2179_v55, 0.0 }
 0x37b   :  { %v2227_v63 = vmax.f32 %v2182_v59, 0.0  ;;  %v3262_v0 = vpop.f32.mrb[80].mxu1 }
 0x37c   :  { %v3263_v4 = vpop.f32.mrb[81].mxu1 }
 0x37d   :  { %v3264_v56 = vadd.f32 %v3263_v4, %v3262_v0  ;;  %v3265_v1 = vpop.f32.mrb[82].mxu1  ;;  %v2242_v29 = vpack.c.bf16 %v2227_v63, %v2226_v60 }
 0x37e   :  { %v3266_v6 = vpop.f32.mrb[83].mxu1 }
 0x37f   :  { %v2187_v2 = vadd.f32 %v3264_v56, %v4935_v40  ;;  %v3267_v11 = vadd.f32 %v3266_v6, %v3265_v1  ;;  %3375 = vmatmul.mubr.bf16.gmra.mrb[128].mxu1 %v2242_v29 }
 0x380   :  { %3378 = vmatprep.mubr.msk.bf16.mxu1 %vm3975_vm1, %v3974_v12 }
 0x381   :  { %v2190_v17 = vadd.f32 %v3267_v11, %v4935_v40  ;;  %v2228_v3 = vmax.f32 %v2187_v2, 0.0 }
 0x383   :  { %v2229_v23 = vmax.f32 %v2190_v17, 0.0  ;;  %v3268_v31 = vpop.f32.mrb[84].mxu1 }
 0x384   :  { %v3269_v25 = vpop.f32.mrb[85].mxu1 }
 0x385   :  { %v3270_v57 = vadd.f32 %v3269_v25, %v3268_v31  ;;  %v3271_v34 = vpop.f32.mrb[86].mxu1  ;;  %v2243_v10 = vpack.c.bf16 %v2229_v23, %v2228_v3 }
 0x386   :  { %v3272_v16 = vpop.f32.mrb[87].mxu1 }
 0x387   :  { %v2195_v19 = vadd.f32 %v3270_v57, %v4935_v40  ;;  %v3273_v46 = vadd.f32 %v3272_v16, %v3271_v34  ;;  %3379 = vmatmul.mubr.bf16.gmra.mrb[132].mxu1 %v2243_v10 }
 0x388   :  { %3382 = vmatprep.mubr.msk.bf16.mxu1 %vm3975_vm1, %v3974_v12 }
 0x389   :  { %v2198_v47 = vadd.f32 %v3273_v46, %v4935_v40  ;;  %v2230_v49 = vmax.f32 %v2195_v19, 0.0 }
 0x38b   :  { %v2231_v35 = vmax.f32 %v2198_v47, 0.0  ;;  %v3274_v36 = vpop.f32.mrb[88].mxu1 }
 0x38c   :  { %v3275_v39 = vpop.f32.mrb[89].mxu1 }
 0x38d   :  { %v3276_v61 = vadd.f32 %v3275_v39, %v3274_v36  ;;  %v3277_v52 = vpop.f32.mrb[90].mxu1  ;;  %v2244_v62 = vpack.c.bf16 %v2231_v35, %v2230_v49 }
 0x38e   :  { %v3278_v26 = vpop.f32.mrb[91].mxu1 }
 0x38f   :  { %v2203_v27 = vadd.f32 %v3276_v61, %v4935_v40  ;;  %3383 = vmatmul.mubr.bf16.gmra.mrb[136].mxu1 %v2244_v62 }
 0x390   :  { %3386 = vmatprep.mubr.msk.bf16.mxu1 %vm3975_vm1, %v3974_v12 }
 0x391   :  { %v2232_v53 = vmax.f32 %v2203_v27, 0.0 }
 0x393   :  { %v2245_v28 = vpack.c.bf16 %v2232_v53, %v2232_v53 }
 0x397   :  { %3387 = vmatmul.mubr.bf16.gmra.mrb[140].mxu1 %v2245_v28 }
 0x398   :  { %3406 = vmatprep.mubr.msk.bf16.mxu1 %vm3975_vm1, %v3974_v12 }
 0x40a   :  { %v2351_v14 = vpop.f32.mrb[92].mxu1 }
 0x40b   :  { %v2352_v5 = vadd.f32 %v5022_v13, %v2351_v14  ;;  %v3340_v38 = vpop.f32.mrb[93].mxu1 }
 0x40c   :  { %v2354_v40 = vpop.f32.mrb[94].mxu1 }
 0x40d   :  { %v2355_v41 = vadd.f32 %v5022_v13, %v2354_v40  ;;  %v3341_v15 = vpop.f32.mrb[95].mxu1  ;;  %v2453_v42 = vmax.f32 %v2352_v5, 0.0 }
 0x40f   :  { %v2454_v21 = vmax.f32 %v2355_v41, 0.0 }
 0x411   :  { %v2478_v22 = vpack.c.bf16 %v2454_v21, %v2453_v42 }
 0x412   :  { %v2359_v43 = vpop.f32.mrb[96].mxu1 }
 0x413   :  { %v2360_v37 = vadd.f32 %v5022_v13, %v2359_v43  ;;  %v3344_v24 = vpop.f32.mrb[97].mxu1  ;;  %3407 = vmatmul.mubr.bf16.vlgmr.msra.gmra.mrb[144].mxu1 %v2478_v22 }
 0x414   :  { %v2362_v44 = vpop.f32.mrb[98].mxu1  ;;  %3410 = vmatprep.mubr.msk.bf16.mxu1 %vm3975_vm1, %v3974_v12 }
 0x415   :  { %v2363_v7 = vadd.f32 %v5022_v13, %v2362_v44  ;;  %v3345_v8 = vpop.f32.mrb[99].mxu1  ;;  %v2455_v30 = vmax.f32 %v2360_v37, 0.0 }
 0x417   :  { %v2456_v32 = vmax.f32 %v2363_v7, 0.0 }
 0x419   :  { %v2479_v33 = vpack.c.bf16 %v2456_v32, %v2455_v30 }
 0x41a   :  { %v2367_v9 = vpop.f32.mrb[100].mxu1 }
 0x41b   :  { %v2368_v18 = vadd.f32 %v5022_v13, %v2367_v9  ;;  %v3348_v20 = vpop.f32.mrb[101].mxu1  ;;  %3411 = vmatmul.mubr.bf16.gmra.mrb[148].mxu1 %v2479_v33 }
 0x41c   :  { %v2370_v45 = vpop.f32.mrb[102].mxu1  ;;  %3414 = vmatprep.mubr.msk.bf16.mxu1 %vm3975_vm1, %v3974_v12 }
 0x41d   :  { %v2371_v50 = vadd.f32 %v5022_v13, %v2370_v45  ;;  %v3349_v51 = vpop.f32.mrb[103].mxu1  ;;  %v2457_v48 = vmax.f32 %v2368_v18, 0.0 }
 0x41f   :  { %v2458_v54 = vmax.f32 %v2371_v50, 0.0 }
 0x421   :  { %v2480_v55 = vpack.c.bf16 %v2458_v54, %v2457_v48 }
 0x422   :  { %v2375_v58 = vpop.f32.mrb[104].mxu1 }
 0x423   :  { %v2376_v59 = vadd.f32 %v5022_v13, %v2375_v58  ;;  %v3352_v60 = vpop.f32.mrb[105].mxu1  ;;  %3415 = vmatmul.mubr.bf16.gmra.mrb[152].mxu1 %v2480_v55 }
 0x424   :  { %v2378_v63 = vpop.f32.mrb[106].mxu1  ;;  %3418 = vmatprep.mubr.msk.bf16.mxu1 %vm3975_vm1, %v3974_v12 }
 0x425   :  { %v2379_v0 = vadd.f32 %v5022_v13, %v2378_v63  ;;  %v3353_v4 = vpop.f32.mrb[107].mxu1  ;;  %v2459_v56 = vmax.f32 %v2376_v59, 0.0 }
 0x427   :  { %v2460_v1 = vmax.f32 %v2379_v0, 0.0 }
 0x429   :  { %v2481_v29 = vpack.c.bf16 %v2460_v1, %v2459_v56 }
 0x42a   :  { %v2383_v6 = vpop.f32.mrb[108].mxu1 }
 0x42b   :  { %v2384_v2 = vadd.f32 %v5022_v13, %v2383_v6  ;;  %v3356_v11 = vpop.f32.mrb[109].mxu1  ;;  %3419 = vmatmul.mubr.bf16.gmra.mrb[156].mxu1 %v2481_v29 }
 0x42c   :  { %v2386_v17 = vpop.f32.mrb[110].mxu1  ;;  %3422 = vmatprep.mubr.msk.bf16.mxu1 %vm3975_vm1, %v3974_v12 }
 0x42d   :  { %v2387_v3 = vadd.f32 %v5022_v13, %v2386_v17  ;;  %v3357_v23 = vpop.f32.mrb[111].mxu1  ;;  %v2461_v31 = vmax.f32 %v2384_v2, 0.0 }
 0x42f   :  { %v2462_v25 = vmax.f32 %v2387_v3, 0.0 }
 0x431   :  { %v2482_v57 = vpack.c.bf16 %v2462_v25, %v2461_v31 }
 0x432   :  { %v2391_v34 = vpop.f32.mrb[112].mxu1 }
 0x433   :  { %v2392_v10 = vadd.f32 %v5022_v13, %v2391_v34  ;;  %v3360_v16 = vpop.f32.mrb[113].mxu1  ;;  %3423 = vmatmul.mubr.bf16.gmra.mrb[160].mxu1 %v2482_v57 }
 0x434   :  { %v2394_v19 = vpop.f32.mrb[114].mxu1  ;;  %3426 = vmatprep.mubr.msk.bf16.mxu1 %vm3975_vm1, %v3974_v12 }
 0x435   :  { %v2395_v46 = vadd.f32 %v5022_v13, %v2394_v19  ;;  %v3361_v47 = vpop.f32.mrb[115].mxu1  ;;  %v2463_v49 = vmax.f32 %v2392_v10, 0.0 }
 0x437   :  { %v2464_v35 = vmax.f32 %v2395_v46, 0.0 }
 0x439   :  { %v2483_v36 = vpack.c.bf16 %v2464_v35, %v2463_v49 }
 0x43a   :  { %v2399_v39 = vpop.f32.mrb[116].mxu1 }
 0x43b   :  { %v2400_v61 = vadd.f32 %v5022_v13, %v2399_v39  ;;  %v3364_v52 = vpop.f32.mrb[117].mxu1  ;;  %3427 = vmatmul.mubr.bf16.gmra.mrb[164].mxu1 %v2483_v36  ;;  %v5076_v36 = vld [vmem:[%s5150_s8] ss:$0 sm:$0xff] }
 0x43c   :  { %v2402_v62 = vpop.f32.mrb[118].mxu1  ;;  %3430 = vmatprep.mubr.msk.bf16.mxu1 %vm3975_vm1, %v3974_v12 }
 0x43d   :  { %v2403_v26 = vadd.f32 %v5022_v13, %v2402_v62  ;;  %v3365_v27 = vpop.f32.mrb[119].mxu1  ;;  %v2465_v53 = vmax.f32 %v2400_v61, 0.0 }
 0x43f   :  { %v2466_v28 = vmax.f32 %v2403_v26, 0.0 }
 0x441   :  { %v2484_v14 = vpack.c.bf16 %v2466_v28, %v2465_v53 }
 0x442   :  { %v2407_v5 = vpop.f32.mrb[120].mxu1 }
 0x443   :  { %v2408_v38 = vadd.f32 %v5022_v13, %v2407_v5  ;;  %v3368_v40 = vpop.f32.mrb[121].mxu1  ;;  %3431 = vmatmul.mubr.bf16.gmra.mrb[168].mxu1 %v2484_v14 }
 0x444   :  { %v2410_v41 = vpop.f32.mrb[122].mxu1  ;;  %3434 = vmatprep.mubr.msk.bf16.mxu1 %vm3975_vm1, %v3974_v12 }
 0x445   :  { %v2411_v15 = vadd.f32 %v5022_v13, %v2410_v41  ;;  %v3369_v42 = vpop.f32.mrb[123].mxu1  ;;  %v2467_v21 = vmax.f32 %v2408_v38, 0.0 }
 0x447   :  { %v2468_v22 = vmax.f32 %v2411_v15, 0.0 }
 0x449   :  { %v2485_v43 = vpack.c.bf16 %v2468_v22, %v2467_v21 }
 0x44a   :  { %v2415_v37 = vpop.f32.mrb[124].mxu1 }
 0x44b   :  { %v2416_v24 = vadd.f32 %v5022_v13, %v2415_v37  ;;  %v3372_v44 = vpop.f32.mrb[125].mxu1  ;;  %3435 = vmatmul.mubr.bf16.gmra.mrb[172].mxu1 %v2485_v43 }
 0x44c   :  { %v2418_v7 = vpop.f32.mrb[126].mxu1  ;;  %3438 = vmatprep.mubr.msk.bf16.mxu1 %vm3975_vm1, %v3974_v12 }
 0x44d   :  { %v2419_v8 = vadd.f32 %v5022_v13, %v2418_v7  ;;  %v3373_v30 = vpop.f32.mrb[127].mxu1  ;;  %v2469_v32 = vmax.f32 %v2416_v24, 0.0 }
 0x44f   :  { %v2470_v33 = vmax.f32 %v2419_v8, 0.0 }
 0x451   :  { %v2486_v9 = vpack.c.bf16 %v2470_v33, %v2469_v32 }
 0x452   :  { %v2423_v18 = vpop.f32.mrb[128].mxu1 }
 0x453   :  { %v2424_v20 = vadd.f32 %v5022_v13, %v2423_v18  ;;  %v3376_v45 = vpop.f32.mrb[129].mxu1  ;;  %3439 = vmatmul.mubr.bf16.gmra.mrb[176].mxu1 %v2486_v9 }
 0x454   :  { %v2426_v50 = vpop.f32.mrb[130].mxu1  ;;  %3442 = vmatprep.mubr.msk.bf16.mxu1 %vm3975_vm1, %v3974_v12 }
 0x455   :  { %v2427_v51 = vadd.f32 %v5022_v13, %v2426_v50  ;;  %v3377_v48 = vpop.f32.mrb[131].mxu1  ;;  %v2471_v54 = vmax.f32 %v2424_v20, 0.0 }
 0x457   :  { %v2472_v55 = vmax.f32 %v2427_v51, 0.0 }
 0x459   :  { %v2487_v58 = vpack.c.bf16 %v2472_v55, %v2471_v54 }
 0x45a   :  { %v2431_v59 = vpop.f32.mrb[132].mxu1 }
 0x45b   :  { %v2432_v60 = vadd.f32 %v5022_v13, %v2431_v59  ;;  %v3380_v63 = vpop.f32.mrb[133].mxu1  ;;  %3443 = vmatmul.mubr.bf16.gmra.mrb[180].mxu1 %v2487_v58 }
 0x45c   :  { %v2434_v0 = vpop.f32.mrb[134].mxu1  ;;  %3446 = vmatprep.mubr.msk.bf16.mxu1 %vm3975_vm1, %v3974_v12 }
 0x45d   :  { %v2435_v4 = vadd.f32 %v5022_v13, %v2434_v0  ;;  %v3381_v56 = vpop.f32.mrb[135].mxu1  ;;  %v2473_v1 = vmax.f32 %v2432_v60, 0.0 }
 0x45f   :  { %v2474_v29 = vmax.f32 %v2435_v4, 0.0 }
 0x461   :  { %v2488_v6 = vpack.c.bf16 %v2474_v29, %v2473_v1 }
 0x462   :  { %v2439_v2 = vpop.f32.mrb[136].mxu1 }
 0x463   :  { %v2440_v11 = vadd.f32 %v5022_v13, %v2439_v2  ;;  %v3384_v17 = vpop.f32.mrb[137].mxu1  ;;  %3447 = vmatmul.mubr.bf16.gmra.mrb[184].mxu1 %v2488_v6 }
 0x464   :  { %v2442_v3 = vpop.f32.mrb[138].mxu1  ;;  %3450 = vmatprep.mubr.msk.bf16.mxu1 %vm3975_vm1, %v3974_v12 }
 0x465   :  { %v2443_v23 = vadd.f32 %v5022_v13, %v2442_v3  ;;  %v3385_v31 = vpop.f32.mrb[139].mxu1  ;;  %v2475_v25 = vmax.f32 %v2440_v11, 0.0 }
 0x467   :  { %v2476_v57 = vmax.f32 %v2443_v23, 0.0 }
 0x469   :  { %v2489_v34 = vpack.c.bf16 %v2476_v57, %v2475_v25 }
 0x46a   :  { %v2447_v10 = vpop.f32.mrb[140].mxu1 }
 0x46b   :  { %v2448_v16 = vadd.f32 %v5022_v13, %v2447_v10  ;;  %v3388_v19 = vpop.f32.mrb[141].mxu1  ;;  %3451 = vmatmul.mubr.bf16.gmra.mrb[188].mxu1 %v2489_v34 }
 0x46c   :  { %v2450_v46 = vpop.f32.mrb[142].mxu1  ;;  %3454 = vmatprep.mubr.msk.bf16.mxu1 %vm3975_vm1, %v3974_v12 }
 0x46d   :  { %v2477_v47 = vmax.f32 %v2448_v16, 0.0  ;;  %v3389_v49 = vpop.f32.mrb[143].mxu1 }
 0x46f   :  { %v2490_v35 = vpack.c.bf16 %v2477_v47, %v2477_v47 }
 0x473   :  { %3455 = vmatmul.mubr.bf16.gmra.mrb[192].mxu1 %v2490_v35 }
 0x4e6   :  { %v2596_v39 = vpop.f32.mrb[144].mxu1 }
 0x4e7   :  { %v3408_v61 = vpop.f32.mrb[145].mxu1  ;;  %v2597_v13 = vadd.f32 %v5076_v36, %v2596_v39 }
 0x4e8   :  { %v2599_v52 = vpop.f32.mrb[146].mxu1 }
 0x4e9   :  { %v2600_v62 = vadd.f32 %v5076_v36, %v2599_v52  ;;  %v3409_v26 = vpop.f32.mrb[147].mxu1 }
 0x4eb   :  { %v3118_v27 = vpack.c.bf16 %v2600_v62, %v2597_v13 }
 0x4ed   :  { %3119 = vst [vmem:[%s5151_s9] sm:$0xff] %v3118_v27  }
 0x4ee   :  { %v2604_v12 = vpop.f32.mrb[148].mxu1 }
 0x4ef   :  { %v3412_v53 = vpop.f32.mrb[149].mxu1  ;;  %v2605_v14 = vadd.f32 %v5076_v36, %v2604_v12 }
 0x4f0   :  { %v2607_v28 = vpop.f32.mrb[150].mxu1 }
 0x4f1   :  { %v2608_v5 = vadd.f32 %v5076_v36, %v2607_v28  ;;  %v3413_v38 = vpop.f32.mrb[151].mxu1 }
 0x4f3   :  { %v3123_v40 = vpack.c.bf16 %v2608_v5, %v2605_v14 }
 0x4f5   :  { %3175 = vst [vmem:[%s5151_s9 + $0x8] sm:$0xff] %v3123_v40  }
 0x4f6   :  { %v2612_v41 = vpop.f32.mrb[152].mxu1 }
 0x4f7   :  { %v3416_v15 = vpop.f32.mrb[153].mxu1  ;;  %v2613_v21 = vadd.f32 %v5076_v36, %v2612_v41 }
 0x4f8   :  { %v2615_v42 = vpop.f32.mrb[154].mxu1 }
 0x4f9   :  { %v2616_v22 = vadd.f32 %v5076_v36, %v2615_v42  ;;  %v3417_v43 = vpop.f32.mrb[155].mxu1 }
 0x4fb   :  { %v3128_v37 = vpack.c.bf16 %v2616_v22, %v2613_v21 }
 0x4fd   :  { %3176 = vst [vmem:[%s5151_s9 + $0x10] sm:$0xff] %v3128_v37  }
 0x4fe   :  { %v2620_v24 = vpop.f32.mrb[156].mxu1 }
 0x4ff   :  { %v3420_v44 = vpop.f32.mrb[157].mxu1  ;;  %v2621_v8 = vadd.f32 %v5076_v36, %v2620_v24 }
 0x500   :  { %v2623_v7 = vpop.f32.mrb[158].mxu1 }
 0x501   :  { %v2624_v30 = vadd.f32 %v5076_v36, %v2623_v7  ;;  %v3421_v32 = vpop.f32.mrb[159].mxu1 }
 0x503   :  { %v3133_v33 = vpack.c.bf16 %v2624_v30, %v2621_v8 }
 0x505   :  { %3177 = vst [vmem:[%s5151_s9 + $0x18] sm:$0xff] %v3133_v33  }
 0x506   :  { %v2628_v9 = vpop.f32.mrb[160].mxu1 }
 0x507   :  { %v3424_v18 = vpop.f32.mrb[161].mxu1  ;;  %v2629_v45 = vadd.f32 %v5076_v36, %v2628_v9 }
 0x508   :  { %v2631_v20 = vpop.f32.mrb[162].mxu1 }
 0x509   :  { %v2632_v50 = vadd.f32 %v5076_v36, %v2631_v20  ;;  %v3425_v51 = vpop.f32.mrb[163].mxu1 }
 0x50b   :  { %v3138_v48 = vpack.c.bf16 %v2632_v50, %v2629_v45 }
 0x50d   :  { %3178 = vst [vmem:[%s5151_s9 + $0x20] sm:$0xff] %v3138_v48  }
 0x50e   :  { %v2636_v54 = vpop.f32.mrb[164].mxu1 }
 0x50f   :  { %v3428_v55 = vpop.f32.mrb[165].mxu1  ;;  %v2637_v59 = vadd.f32 %v5076_v36, %v2636_v54 }
 0x510   :  { %v2639_v58 = vpop.f32.mrb[166].mxu1 }
 0x511   :  { %v2640_v60 = vadd.f32 %v5076_v36, %v2639_v58  ;;  %v3429_v63 = vpop.f32.mrb[167].mxu1 }
 0x513   :  { %v3143_v0 = vpack.c.bf16 %v2640_v60, %v2637_v59 }
 0x515   :  { %3179 = vst [vmem:[%s5151_s9 + $0x28] sm:$0xff] %v3143_v0  }
 0x516   :  { %v2644_v4 = vpop.f32.mrb[168].mxu1 }
 0x517   :  { %v3432_v56 = vpop.f32.mrb[169].mxu1  ;;  %v2645_v29 = vadd.f32 %v5076_v36, %v2644_v4 }
 0x518   :  { %v2647_v1 = vpop.f32.mrb[170].mxu1 }
 0x519   :  { %v2648_v6 = vadd.f32 %v5076_v36, %v2647_v1  ;;  %v3433_v2 = vpop.f32.mrb[171].mxu1 }
 0x51b   :  { %v3148_v11 = vpack.c.bf16 %v2648_v6, %v2645_v29 }
 0x51d   :  { %3180 = vst [vmem:[%s5151_s9 + $0x30] sm:$0xff] %v3148_v11  }
 0x51e   :  { %v2652_v17 = vpop.f32.mrb[172].mxu1 }
 0x51f   :  { %v3436_v3 = vpop.f32.mrb[173].mxu1  ;;  %v2653_v31 = vadd.f32 %v5076_v36, %v2652_v17 }
 0x520   :  { %v2655_v23 = vpop.f32.mrb[174].mxu1 }
 0x521   :  { %v2656_v25 = vadd.f32 %v5076_v36, %v2655_v23  ;;  %v3437_v57 = vpop.f32.mrb[175].mxu1 }
 0x523   :  { %v3153_v34 = vpack.c.bf16 %v2656_v25, %v2653_v31 }
 0x525   :  { %3181 = vst [vmem:[%s5151_s9 + $0x38] sm:$0xff] %v3153_v34  }
 0x526   :  { %v2660_v10 = vpop.f32.mrb[176].mxu1 }
 0x527   :  { %v3440_v16 = vpop.f32.mrb[177].mxu1  ;;  %v2661_v46 = vadd.f32 %v5076_v36, %v2660_v10 }
 0x528   :  { %v2663_v19 = vpop.f32.mrb[178].mxu1 }
 0x529   :  { %v2664_v47 = vadd.f32 %v5076_v36, %v2663_v19  ;;  %v3441_v49 = vpop.f32.mrb[179].mxu1 }
 0x52b   :  { %v3158_v35 = vpack.c.bf16 %v2664_v47, %v2661_v46 }
 0x52d   :  { %3182 = vst [vmem:[%s5151_s9 + $0x40] sm:$0xff] %v3158_v35  }
 0x52e   :  { %v2668_v39 = vpop.f32.mrb[180].mxu1 }
 0x52f   :  { %v3444_v61 = vpop.f32.mrb[181].mxu1  ;;  %v2669_v13 = vadd.f32 %v5076_v36, %v2668_v39 }
 0x530   :  { %v2671_v52 = vpop.f32.mrb[182].mxu1 }
 0x531   :  { %v2672_v62 = vadd.f32 %v5076_v36, %v2671_v52  ;;  %v3445_v26 = vpop.f32.mrb[183].mxu1 }
 0x533   :  { %v3163_v27 = vpack.c.bf16 %v2672_v62, %v2669_v13 }
 0x535   :  { %3183 = vst [vmem:[%s5151_s9 + $0x48] sm:$0xff] %v3163_v27  }
 0x536   :  { %v2676_v12 = vpop.f32.mrb[184].mxu1 }
 0x537   :  { %v3448_v53 = vpop.f32.mrb[185].mxu1  ;;  %v2677_v14 = vadd.f32 %v5076_v36, %v2676_v12 }
 0x538   :  { %v2679_v28 = vpop.f32.mrb[186].mxu1 }
 0x539   :  { %v2680_v5 = vadd.f32 %v5076_v36, %v2679_v28  ;;  %v3449_v38 = vpop.f32.mrb[187].mxu1 }
 0x53b   :  { %v3168_v40 = vpack.c.bf16 %v2680_v5, %v2677_v14 }
 0x53d   :  { %3184 = vst [vmem:[%s5151_s9 + $0x50] sm:$0xff] %v3168_v40  }
 0x53e   :  { %v2684_v41 = vpop.f32.mrb[188].mxu1 }
 0x53f   :  { %v3452_v15 = vpop.f32.mrb[189].mxu1  ;;  %v2685_v21 = vadd.f32 %v5076_v36, %v2684_v41 }
 0x540   :  { %v2687_v42 = vpop.f32.mrb[190].mxu1 }
 0x541   :  { %v2688_v22 = vadd.f32 %v5076_v36, %v2687_v42  ;;  %v3453_v43 = vpop.f32.mrb[191].mxu1 }
 0x543   :  { %v3173_v37 = vpack.c.bf16 %v2688_v22, %v2685_v21 }
 0x545   :  { %3185 = vst [vmem:[%s5151_s9 + $0x58] sm:$0xff] %v3173_v37  }
 0x546   :  { %v2692_v24 = vpop.f32.mrb[192].mxu1 }
 0x547   :  { %v2693_v44 = vadd.f32 %v5076_v36, %v2692_v24  ;;  %v3456_v7 = vpop.f32.mrb[193].mxu1 }
 0x548   :  { %v2695_v8 = vpop.f32.mrb[194].mxu1 }
 0x549   :  { %v3114_v30 = vpack.c.bf16 %v2693_v44, %v2693_v44  ;;  %v3457_v32 = vpop.f32.mrb[195].mxu1 }
 0x54b   :  { %2823 = vst [vmem:[%s5151_s9 + $0x60] sm:$0xf] %v3114_v30 }

</bundles_post_ra>
